<compile_context>
chip_gen: v5e
topology: v5e:2x2
jax: 0.10.0
libtpu: 0.0.40
codegen_flags: <defaults>
</compile_context>

<pallas_src>
import numpy as np
import jax
import jax.numpy as jnp
from jax.experimental import pallas as pl
from jax.experimental.pallas import tpu as pltpu

# ---- module hyper-parameters (from the PyTorch __init__) -------------------
KH, KW = 3, 9          # kernel_size
SH, SW = 2, 8          # stride
PH, PW = 0, 7          # padding
DH, DW = 2, 1          # dilation
H_IN, W_IN = 6, 9      # input spatial size (from the script's x)
H_OUT, W_OUT = 4, 10   # Fold output_size
N, C = 20, 16          # batch, channels

OUT_PAD = 128          # lane-dense padded output width (>= H_OUT*W_OUT = 40)


def _num_blocks(size, k, s, p, d):
    return (size + 2 * p - d * (k - 1) - 1) // s + 1


LH = _num_blocks(H_IN, KH, SH, PH, DH)   # -> 1
LW = _num_blocks(W_IN, KW, SW, PW, DW)   # -> 2
L = LH * LW                              # -> 2
K = KH * KW                              # -> 27


def _build_fused_weight():
    """Build U (gather / im2col) and Fm (scatter / col2im) 0/1 matrices, then
    fuse them into a single W = U.T @ Fm, plus a 128-lane zero-padded copy."""
    U = np.zeros((K * L, H_IN * W_IN), np.float32)
    Fm = np.zeros((K * L, H_OUT * W_OUT), np.float32)
    for i in range(KH):
        for j in range(KW):
            for lh in range(LH):
                for lw in range(LW):
                    row = (i * KW + j) * L + lh * LW + lw
                    h = lh * SH - PH + i * DH
                    w = lw * SW - PW + j * DW
                    if 0 <= h < H_IN and 0 <= w < W_IN:
                        U[row, h * W_IN + w] = 1.0
                    if 0 <= h < H_OUT and 0 <= w < W_OUT:
                        Fm[row, h * W_OUT + w] = 1.0
    W = U.T @ Fm                                       # (54, 40)
    Wp = np.zeros((H_IN * W_IN, OUT_PAD), np.float32)  # (54, 128)
    Wp[:, : H_OUT * W_OUT] = W                         # padded lanes stay 0
    return W, Wp


# Built ONCE at module scope; baked as device constants by jit.
_W_NP, _W_PAD_NP = _build_fused_weight()
_W_PAD = jnp.asarray(_W_PAD_NP)


# ---- Pallas kernel ----------------------------------------------------------
def unfold_fold_kernel(x_ref, w_ref, o_ref):
    # x_ref: (N*C, H_IN*W_IN), w_ref: (H_IN*W_IN, OUT_PAD), o_ref: (N*C, OUT_PAD)
    o_ref[...] = jnp.dot(
        x_ref[...], w_ref[...],
        preferred_element_type=jnp.float32,
        precision=jax.lax.Precision.HIGHEST,
    ).astype(o_ref.dtype)


@jax.jit
def model_forward(x):
    """x: (N, C, H_IN, W_IN) float32 -> (N, C, H_OUT, W_OUT) float32"""
    n, c, h, w = x.shape
    assert (h, w) == (H_IN, W_IN)
    nc, hw = n * c, h * w
    x_flat = x.reshape(nc, hw)

    cost = pl.CostEstimate(
        flops=2 * nc * hw * OUT_PAD,
        transcendentals=0,
        bytes_accessed=4 * (nc * hw + hw * OUT_PAD + nc * OUT_PAD),
    )

    out_pad = pl.pallas_call(
        unfold_fold_kernel,
        out_shape=jax.ShapeDtypeStruct((nc, OUT_PAD), x.dtype),
        in_specs=[
            pl.BlockSpec(memory_space=pltpu.MemorySpace.VMEM),
            pl.BlockSpec(memory_space=pltpu.MemorySpace.VMEM),
        ],
        out_specs=pl.BlockSpec(memory_space=pltpu.MemorySpace.VMEM),
        cost_estimate=cost,
    )(x_flat, _W_PAD)

    # Drop the zero-padded lanes, restore NCHW.
    return out_pad[:, : H_OUT * W_OUT].reshape(n, c, H_OUT, W_OUT)


if __name__ == "__main__":
    key = jax.random.PRNGKey(0)
    x = jax.random.normal(key, (N, C, H_IN, W_IN), dtype=jnp.float32)

    out = jax.block_until_ready(model_forward(x))
    assert out.shape == (N, C, H_OUT, W_OUT)

    # pure-numpy reference of the same unfold->fold composition
    ref = (np.asarray(x).reshape(N * C, H_IN * W_IN) @ _W_NP).reshape(
        N, C, H_OUT, W_OUT)
    np.testing.assert_allclose(np.asarray(out), ref, rtol=1e-5, atol=1e-5)

    print("KERNEL_OK")
</pallas_src>

<mosaic_0001>
module attributes {stable_mosaic.version = 11 : i64} {
  func.func @unfold_fold_kernel(%arg0: memref<320x54xf32, #tpu.memory_space<vmem>>, %arg1: memref<54x128xf32, #tpu.memory_space<vmem>>, %arg2: memref<320x128xf32, #tpu.memory_space<vmem>>) attributes {dimension_semantics = [], scalar_prefetch = 0 : i64, scratch_operands = 0 : i64, tpu.core_type = #tpu.core_type<tc>} {
    %c0 = arith.constant 0 : index
    %c0_0 = arith.constant 0 : index
    %0 = vector.load %arg0[%c0, %c0_0] : memref<320x54xf32, #tpu.memory_space<vmem>>, vector<320x54xf32>
    %c0_1 = arith.constant 0 : index
    %c0_2 = arith.constant 0 : index
    %1 = vector.load %arg1[%c0_1, %c0_2] : memref<54x128xf32, #tpu.memory_space<vmem>>, vector<54x128xf32>
    %cst = arith.constant dense<0.000000e+00> : vector<320x128xf32>
    %2 = tpu.matmul %0, %1, %cst {dimension_numbers = #tpu.dot_dimension_numbers<[1], [0], [0], [1], [0, 0, 1, 1], [], []>, precision = #tpu.contract_precision<fp32>} : vector<320x54xf32>, vector<54x128xf32>, vector<320x128xf32> -> vector<320x128xf32>
    %c0_3 = arith.constant 0 : index
    %c0_4 = arith.constant 0 : index
    %3 = vector.load %arg2[%c0_3, %c0_4] : memref<320x128xf32, #tpu.memory_space<vmem>>, vector<320x128xf32>
    tpu.vector_store %arg2[%c0_3, %c0_4], %2 {strides = array<i32>} : memref<320x128xf32, #tpu.memory_space<vmem>>, vector<320x128xf32>,
    return
  }
}

</mosaic_0001>

<bundles_post_ra>
// kernel: model_forward.1
= control target key start
LH: loop header
LB: loop body
LE: loop exit
PB: predicated region body
PF: predicated region fallthrough
CT: control target
= control target key end

     0   :  { %vm179_vm0 = vcmask 1045504   ;;  %vm58_vm1 = vcmask 441344   ;;  %s2882_s1 = inlined_call_operand.vmem [shape: f32[54,128], index: 1, kind: input, shape index: {}]   ;;  %s2883_s0 = inlined_call_operand.vmem [shape: f32[320,54], index: 0, kind: input, shape index: {}]   ;;  %s2884_s2 = inlined_call_operand.vmem [shape: f32[320,128], index: 2, kind: output, shape index: {}]  }
   0x1   :  { %v57_v0 = vld [vmem:[%s2882_s1 + $0x30] sm:$0x3f]  ;;  %v56_v1 = vld [vmem:[%s2882_s1 + $0x28] sm:$0xff]  ;;  %v55_v2 = vld [vmem:[%s2882_s1 + $0x20] sm:$0xff] }
   0x2   :  { %v181_v3 = vsel %vm179_vm0, %v57_v0, 0  ;;  %v1698_v4 = vand.u32 4294901760, %v56_v1  ;;  %v1700_v5 = vand.u32 4294901760, %v55_v2  ;;  %v54_v6 = vld [vmem:[%s2882_s1 + $0x18] sm:$0xff]  ;;  %v53_v7 = vld [vmem:[%s2882_s1 + $0x10] sm:$0xff]  ;;  %v52_v8 = vld [vmem:[%s2882_s1 + $0x8] sm:$0xff] }
   0x3   :  { %v1711_v9 = vand.u32 4294901760, %v181_v3  ;;  %v1713_v10 = vand.u32 4294901760, %v54_v6  ;;  %v1715_v11 = vand.u32 4294901760, %v53_v7  ;;  %v1717_v12 = vand.u32 4294901760, %v52_v8  ;;  %v51_v13 = vld [vmem:[%s2882_s1] sm:$0xff]  ;;  %v32_v35 = vld [vmem:[%s2883_s0 + $0xa8] sm:$0xff] }
   0x4   :  { %v31_v14 = vld [vmem:[%s2883_s0 + $0xa0] sm:$0xff]  ;;  %v1726_v15 = vsub.f32 %v56_v1, %v1698_v4  ;;  %v1728_v16 = vand.u32 4294901760, %v51_v13  ;;  %v1731_v17 = vsub.f32 %v55_v2, %v1700_v5  ;;  %v33_v38 = vld [vmem:[%s2883_s0 + $0xb0] sm:$0xff]  ;;  %v12_v43 = vld [vmem:[%s2883_s0 + $0x8] sm:$0xff]  ;;  %v123_v46 = vsel %vm58_vm1, %v32_v35, 0 }
   0x5   :  { %v120_v18 = vsel %vm58_vm1, %v31_v14, 0  ;;  %1660 = vmatpush.msra.mxu2 %v1711_v9  ;;  %v1736_v19 = vsub.f32 %v181_v3, %v1711_v9  ;;  %v1741_v21 = vsub.f32 %v54_v6, %v1713_v10  ;;  %193 = vmatpush.msra.mxu0 %v1711_v9  ;;  %v1745_v22 = vsub.f32 %v53_v7, %v1715_v11  ;;  %v11_v36 = vld [vmem:[%s2883_s0] sm:$0xff]  ;;  %v13_v52 = vld [vmem:[%s2883_s0 + $0x10] sm:$0xff]  ;;  %v34_v61 = vld [vmem:[%s2883_s0 + $0xb8] sm:$0xff] }
   0x6   :  { %v1738_v20 = vand.u32 4294901760, %v120_v18  ;;  %v544_v23 = vand.u32 4294901760, %v1726_v15  ;;  %v550_v24 = vand.u32 4294901760, %v1731_v17  ;;  %v1750_v25 = vsub.f32 %v52_v8, %v1717_v12  ;;  %v14_v35 = vld [vmem:[%s2883_s0 + $0x18] sm:$0xff] }
   0x7   :  { %1661 = vmatpush.msra.mxu2 %v1698_v4  ;;  %v538_v26 = vand.u32 4294901760, %v1736_v19  ;;  %v556_v28 = vand.u32 4294901760, %v1741_v21  ;;  %195 = vmatpush.msra.mxu0 %v1698_v4  ;;  %v562_v30 = vand.u32 4294901760, %v1745_v22  ;;  %v1764_v31 = vsub.f32 %v51_v13, %v1728_v16 }
   0x8   :  { %v1755_v27 = vsub.f32 %v120_v18, %v1738_v20  ;;  %v545_v29 = vsub.f32 %v1726_v15, %v544_v23  ;;  %v551_v33 = vsub.f32 %v1731_v17, %v550_v24  ;;  %v568_v37 = vand.u32 4294901760, %v1750_v25 }
   0x9   :  { %1662 = vmatpush.msra.mxu2 %v1700_v5  ;;  %v539_v32 = vsub.f32 %v1736_v19, %v538_v26  ;;  %197 = vmatpush.msra.mxu0 %v1700_v5  ;;  %v557_v42 = vsub.f32 %v1741_v21, %v556_v28  ;;  %v563_v44 = vsub.f32 %v1745_v22, %v562_v30  ;;  %v574_v45 = vand.u32 4294901760, %v1764_v31 }
   0xa   :  { %v2893_v34 = vand.u32 4294901760, %v1755_v27  ;;  %v546_v40 = vand.u32 4294901760, %v545_v29  ;;  %v60_v47 = vsel %vm58_vm1, %v11_v36, 0  ;;  %v552_v48 = vand.u32 4294901760, %v551_v33 }
   0xb   :  { %1663 = vmatpush.msra.mxu2 %v1713_v10  ;;  %v540_v39 = vand.u32 4294901760, %v539_v32  ;;  %199 = vmatpush.msra.mxu0 %v1713_v10  ;;  %v1803_v49 = vand.u32 4294901760, %v123_v46  ;;  %v1805_v50 = vand.u32 4294901760, %v60_v47  ;;  %v126_v51 = vsel %vm58_vm1, %v33_v38, 0 }
   0xc   :  { %v369_v41 = vsub.f32 %v1755_v27, %v2893_v34  ;;  %v569_v54 = vsub.f32 %v1750_v25, %v568_v37  ;;  %v1815_v55 = vand.u32 4294901760, %v126_v51  ;;  %v63_v56 = vsel %vm58_vm1, %v12_v43, 0 }
   0xd   :  { %1664 = vmatpush.msra.mxu2 %v1715_v11  ;;  %1667 = vmatpush.msra.mxu3 %v540_v39  ;;  %2999 = vst [vmem:[#allocation2_spill] sm:$0xff] %v1803_v49  ;;  %v558_v57 = vand.u32 4294901760, %v557_v42  ;;  %v1820_v58 = vsub.f32 %v123_v46, %v1803_v49  ;;  %v1823_v59 = vsub.f32 %v60_v47, %v1805_v50  ;;  %v1825_v60 = vand.u32 4294901760, %v63_v56  ;;  %v15_v47 = vld [vmem:[%s2883_s0 + $0x20] sm:$0xff] }
   0xe   :  { %v370_v53 = vand.u32 4294901760, %v369_v41  ;;  %541 = vmatpush.msra.mxu1 %v540_v39  ;;  %201 = vmatpush.msra.mxu0 %v1715_v11  ;;  %3000 = vst [vmem:[#allocation3_spill] sm:$0xff] %v1815_v55  ;;  %v575_v62 = vsub.f32 %v1764_v31, %v574_v45  ;;  %v66_v63 = vsel %vm58_vm1, %v13_v52, 0  ;;  %v564_v0 = vand.u32 4294901760, %v563_v44 }
   0xf   :  { %1665 = vmatpush.msra.mxu2 %v1717_v12  ;;  %1668 = vmatpush.msra.mxu3 %v546_v40  ;;  %v2892_v1 = vand.u32 4294901760, %v1820_v58  ;;  %v2907_v2 = vand.u32 4294901760, %v1823_v59  ;;  %v1839_v3 = vsub.f32 %v63_v56, %v1825_v60  ;;  %v570_v6 = vand.u32 4294901760, %v569_v54 }
  0x10   :  { %547 = vmatpush.msra.mxu1 %v546_v40  ;;  %203 = vmatpush.msra.mxu0 %v1717_v12  ;;  %v1842_v7 = vsub.f32 %v126_v51, %v1815_v55  ;;  %v129_v8 = vsel %vm58_vm1, %v34_v61, 0  ;;  %v1853_v29 = vand.u32 4294901760, %v66_v63  ;;  %v576_v32 = vand.u32 4294901760, %v575_v62 }
  0x11   :  { %1666 = vmatpush.msra.mxu2 %v1728_v16  ;;  %1669 = vmatpush.msra.mxu3 %v552_v48  ;;  %v377_v13 = vsub.f32 %v1820_v58, %v2892_v1  ;;  %v209_v14 = vsub.f32 %v1823_v59, %v2907_v2  ;;  %v2905_v18 = vand.u32 4294901760, %v1839_v3  ;;  %v1862_v39 = vand.u32 4294901760, %v129_v8 }
  0x12   :  { %371 = vmatmul.f32.vlgmr.msra.gmra.mxu2 %v370_v53  ;;  %553 = vmatpush.msra.mxu1 %v552_v48  ;;  %3001 = vst [vmem:[#allocation4_spill] sm:$0xff] %v1842_v7  ;;  %v2891_v38 = vand.u32 4294901760, %v1842_v7  ;;  %v69_v41 = vsel %vm58_vm1, %v14_v35, 0  ;;  %v72_v53 = vsel %vm58_vm1, %v15_v47, 0 }
  0x13   :  { %1670 = vmatpush.msra.mxu3 %v558_v57  ;;  %750 = vmatpush.msrb.mxu2 %v1736_v19  ;;  %v210_v33 = vand.u32 4294901760, %v209_v14  ;;  %v378_v36 = vand.u32 4294901760, %v377_v13  ;;  %3002 = vst [vmem:[#allocation5_spill] sm:$0xff] %v1862_v39  ;;  %v217_v40 = vsub.f32 %v1839_v3, %v2905_v18  ;;  %v1869_v19 = vsub.f32 %v66_v63, %v1853_v29 }
  0x14   :  { %559 = vmatpush.msra.mxu1 %v558_v57  ;;  %205 = vmatpush.msra.mxu0 %v1728_v16  ;;  %v385_v42 = vsub.f32 %v1842_v7, %v2891_v38  ;;  %v1883_v43 = vsub.f32 %v129_v8, %v1862_v39  ;;  %v1888_v46 = vand.u32 4294901760, %v69_v41  ;;  %v1929_v57 = vand.u32 4294901760, %v72_v53 }
  0x15   :  { %1671 = vmatpush.msra.mxu3 %v564_v0  ;;  %753 = vmatpush.msrb.mxu2 %v1726_v15  ;;  %v218_v15 = vand.u32 4294901760, %v217_v40 }
  0x16   :  { %1246 = vmatpush.msrb.mxu0 %v538_v26  ;;  %565 = vmatpush.msra.mxu1 %v564_v0  ;;  %v35_v26 = vld [vmem:[%s2883_s0 + $0xc0] sm:$0xff]  ;;  %3003 = vst [vmem:[#allocation6_spill] sm:$0xff] %v1883_v43  ;;  %v386_v48 = vand.u32 4294901760, %v385_v42  ;;  %v2890_v51 = vand.u32 4294901760, %v1883_v43  ;;  %v1950_v62 = vsub.f32 %v72_v53, %v1929_v57 }
  0x17   :  { %1672 = vmatpush.msra.mxu3 %v570_v6  ;;  %211 = vmatmul.f32.vlgmr.msra.gmra.mxu0 %v210_v33  ;;  %v132_v44 = vsel %vm58_vm1, %v35_v26, 0 }
  0x18   :  { %571 = vmatpush.msra.mxu1 %v570_v6  ;;  %1250 = vmatpush.msrb.mxu0 %v544_v23  ;;  %v2904_v23 = vand.u32 4294901760, %v1869_v19  ;;  %v1899_v52 = vand.u32 4294901760, %v132_v44  ;;  %v2901_v6 = vand.u32 4294901760, %v1950_v62 }
  0x19   :  { %1673 = vmatpush.msra.mxu3 %v576_v32  ;;  %756 = vmatpush.msrb.mxu2 %v1731_v17  ;;  %v1908_v17 = vsub.f32 %v69_v41, %v1888_v46 }
  0x1a   :  { %379 = vmatmul.f32.gmra.mxu2 %v378_v36  ;;  %659 = vmatmul.f32.vlgmr.msra.gmra.mxu3 %v1738_v20  ;;  %3004 = vst [vmem:[#allocation7_spill] sm:$0xff] %v1899_v52 }
  0x1b   :  { %980 = vmatpush.msrb.mxu3 %v1711_v9  ;;  %577 = vmatpush.msra.mxu1 %v576_v32  ;;  %v2903_v54 = vand.u32 4294901760, %v1908_v17  ;;  %v241_v32 = vsub.f32 %v1950_v62, %v2901_v6 }
  0x1c   :  { %579 = vmatmul.f32.vlgmr.msra.gmra.mxu1 %v1805_v50  ;;  %1254 = vmatpush.msrb.mxu0 %v550_v24  ;;  %v36_v24 = vld [vmem:[%s2883_s0 + $0xc8] sm:$0xff] }
  0x1d   :  { %1442 = vmatpush.msrb.mxu1 %v1711_v9  ;;  %982 = vmatpush.msrb.mxu3 %v1698_v4  ;;  %v225_v9 = vsub.f32 %v1869_v19, %v2904_v23  ;;  %v135_v56 = vsel %vm58_vm1, %v36_v24, 0  ;;  %v242_v26 = vand.u32 4294901760, %v241_v32 }
  0x1e   :  { %759 = vmatpush.msrb.mxu2 %v1741_v21  ;;  %1258 = vmatpush.msrb.mxu0 %v556_v28  ;;  %v1925_v21 = vsub.f32 %v132_v44, %v1899_v52  ;;  %v1941_v61 = vand.u32 4294901760, %v135_v56  ;;  %v18_v44 = vld [vmem:[%s2883_s0 + $0x38] sm:$0xff] }
  0x1f   :  { %219 = vmatmul.f32.gmra.mxu0 %v218_v15  ;;  %1444 = vmatpush.msrb.mxu1 %v1698_v4  ;;  %v393_v4 = vsub.f32 %v1883_v43, %v2890_v51  ;;  %v226_v28 = vand.u32 4294901760, %v225_v9 }
  0x20   :  { %984 = vmatpush.msrb.mxu3 %v1700_v5  ;;  %762 = vmatpush.msrb.mxu2 %v1745_v22  ;;  %3005 = vst [vmem:[#allocation8_spill] sm:$0xff] %v1925_v21 }
  0x21   :  { %1446 = vmatpush.msrb.mxu1 %v1700_v5  ;;  %1262 = vmatpush.msrb.mxu0 %v562_v30  ;;  %v16_v5 = vld [vmem:[%s2883_s0 + $0x28] sm:$0xff]  ;;  %v394_v22 = vand.u32 4294901760, %v393_v4  ;;  %v2889_v30 = vand.u32 4294901760, %v1925_v21  ;;  %3006 = vst [vmem:[#allocation9_spill] sm:$0xff] %v1941_v61  ;;  %v39_v4 = vld [vmem:[%s2883_s0 + $0xe0] sm:$0xff] }
  0x22   :  { %387 = vmatmul.f32.gmra.mxu2 %v386_v48  ;;  %663 = vmatmul.f32.gmra.mxu3 %v1803_v49  ;;  %v75_v63 = vsel %vm58_vm1, %v16_v5, 0 }
  0x23   :  { %986 = vmatpush.msrb.mxu3 %v1713_v10  ;;  %1448 = vmatpush.msrb.mxu1 %v1713_v10  ;;  %v233_v10 = vsub.f32 %v1908_v17, %v2903_v54  ;;  %v1970_v8 = vand.u32 4294901760, %v75_v63 }
  0x24   :  { %583 = vmatmul.f32.gmra.mxu1 %v1825_v60  ;;  %765 = vmatpush.msrb.mxu2 %v1750_v25  ;;  %v401_v25 = vsub.f32 %v1925_v21, %v2889_v30 }
  0x25   :  { %988 = vmatpush.msrb.mxu3 %v1715_v11  ;;  %1450 = vmatpush.msrb.mxu1 %v1715_v11  ;;  %v37_v11 = vld [vmem:[%s2883_s0 + $0xd0] sm:$0xff]  ;;  %v234_v0 = vand.u32 4294901760, %v233_v10  ;;  %v1984_v33 = vsub.f32 %v75_v63, %v1970_v8 }
  0x26   :  { %1266 = vmatpush.msrb.mxu0 %v568_v37  ;;  %768 = vmatpush.msrb.mxu2 %v1764_v31  ;;  %v1966_v37 = vsub.f32 %v135_v56, %v1941_v61  ;;  %v17_v31 = vld [vmem:[%s2883_s0 + $0x30] sm:$0xff] }
  0x27   :  { %227 = vmatmul.f32.gmra.mxu0 %v226_v28  ;;  %990 = vmatpush.msrb.mxu3 %v1717_v12  ;;  %v78_v35 = vsel %vm58_vm1, %v17_v31, 0  ;;  %v2899_v41 = vand.u32 4294901760, %v1984_v33  ;;  %v81_v28 = vsel %vm58_vm1, %v18_v44, 0 }
  0x28   :  { %1452 = vmatpush.msrb.mxu1 %v1717_v12  ;;  %1270 = vmatpush.msrb.mxu0 %v574_v45  ;;  %3007 = vst [vmem:[#allocation10_spill] sm:$0xff] %v1966_v37  ;;  %v138_v12 = vsel %vm58_vm1, %v37_v11, 0  ;;  %v402_v45 = vand.u32 4294901760, %v401_v25  ;;  %v2887_v13 = vand.u32 4294901760, %v1966_v37  ;;  %v1999_v15 = vand.u32 4294901760, %v78_v35  ;;  %v19_v25 = vld [vmem:[%s2883_s0 + $0x40] sm:$0xff] }
  0x29   :  { %992 = vmatpush.msrb.mxu3 %v1728_v16  ;;  %v1978_v14 = vand.u32 4294901760, %v138_v12  ;;  %v249_v24 = vsub.f32 %v1984_v33, %v2899_v41  ;;  %v144_v11 = vsel %vm58_vm1, %v39_v4, 0  ;;  %v2027_v63 = vand.u32 4294901760, %v81_v28  ;;  %v20_v4 = vld [vmem:[%s2883_s0 + $0x48] sm:$0xff] }
  0x2a   :  { %395 = vmatmul.f32.gmra.mxu2 %v394_v22  ;;  %667 = vmatmul.f32.gmra.mxu3 %v1815_v55  ;;  %v409_v36 = vsub.f32 %v1966_v37, %v2887_v13  ;;  %v2012_v53 = vsub.f32 %v78_v35, %v1999_v15  ;;  %v2034_v31 = vand.u32 4294901760, %v144_v11  ;;  %v84_v35 = vsel %vm58_vm1, %v19_v25, 0 }
  0x2b   :  { %1454 = vmatpush.msrb.mxu1 %v1728_v16  ;;  %3008 = vst [vmem:[#allocation11_spill] sm:$0xff] %v1978_v14  ;;  %v38_v16 = vld [vmem:[%s2883_s0 + $0xd8] sm:$0xff]  ;;  %v1995_v40 = vsub.f32 %v138_v12, %v1978_v14  ;;  %v250_v22 = vand.u32 4294901760, %v249_v24  ;;  %v2040_v32 = vsub.f32 %v81_v28, %v2027_v63  ;;  %v2055_v24 = vand.u32 4294901760, %v84_v35 }
  0x2c   :  { %587 = vmatmul.f32.gmra.mxu1 %v1853_v29  ;;  %v141_v42 = vsel %vm58_vm1, %v38_v16, 0  ;;  %v410_v47 = vand.u32 4294901760, %v409_v36  ;;  %v2898_v10 = vand.u32 4294901760, %v2012_v53  ;;  %3012 = vst [vmem:[#allocation15_spill] sm:$0xff] %v2034_v31  ;;  %v40_v16 = vld [vmem:[%s2883_s0 + $0xe8] sm:$0xff] }
  0x2d   :  { %3009 = vst [vmem:[#allocation12_spill] sm:$0xff] %v1995_v40  ;;  %v2886_v48 = vand.u32 4294901760, %v1995_v40  ;;  %v2006_v9 = vand.u32 4294901760, %v141_v42  ;;  %v2897_v44 = vand.u32 4294901760, %v2040_v32  ;;  %v2068_v25 = vsub.f32 %v84_v35, %v2055_v24 }
  0x2f   :  { %235 = vmatmul.f32.gmra.mxu0 %v234_v0  ;;  %3010 = vst [vmem:[#allocation13_spill] sm:$0xff] %v2006_v9  ;;  %v417_v56 = vsub.f32 %v1995_v40, %v2886_v48  ;;  %v2023_v5 = vsub.f32 %v141_v42, %v2006_v9  ;;  %v2895_v35 = vand.u32 4294901760, %v2068_v25 }
  0x31   :  { %3011 = vst [vmem:[#allocation14_spill] sm:$0xff] %v2023_v5  ;;  %v418_v0 = vand.u32 4294901760, %v417_v56  ;;  %v2885_v12 = vand.u32 4294901760, %v2023_v5 }
  0x32   :  { %403 = vmatmul.f32.gmra.mxu2 %v402_v45  ;;  %671 = vmatmul.f32.gmra.mxu3 %v1862_v39  ;;  %v257_v45 = vsub.f32 %v2012_v53, %v2898_v10 }
  0x33   :  { %v425_v36 = vsub.f32 %v2023_v5, %v2885_v12 }
  0x34   :  { %591 = vmatmul.f32.gmra.mxu1 %v1888_v46  ;;  %v258_v42 = vand.u32 4294901760, %v257_v45  ;;  %v87_v45 = vsel %vm58_vm1, %v20_v4, 0  ;;  %v21_v4 = vld [vmem:[%s2883_s0 + $0x50] sm:$0xff] }
  0x35   :  { %v426_v28 = vand.u32 4294901760, %v425_v36  ;;  %v2083_v48 = vand.u32 4294901760, %v87_v45  ;;  %v90_v30 = vsel %vm58_vm1, %v21_v4, 0  ;;  %v22_v4 = vld [vmem:[%s2883_s0 + $0x58] sm:$0xff] }
  0x36   :  { %v2111_v1 = vand.u32 4294901760, %v90_v30 }
  0x37   :  { %243 = vmatmul.f32.gmra.mxu0 %v242_v26  ;;  %v2051_v26 = vsub.f32 %v144_v11, %v2034_v31  ;;  %v265_v11 = vsub.f32 %v2040_v32, %v2897_v44 }
  0x39   :  { %3013 = vst [vmem:[#allocation16_spill] sm:$0xff] %v2051_v26  ;;  %v2888_v56 = vand.u32 4294901760, %v2051_v26 }
  0x3a   :  { %411 = vmatmul.f32.gmra.mxu2 %v410_v47  ;;  %675 = vmatmul.f32.gmra.mxu3 %v1899_v52  ;;  %v147_v47 = vsel %vm58_vm1, %v40_v16, 0 }
  0x3b   :  { %v433_v16 = vsub.f32 %v2051_v26, %v2888_v56 }
  0x3c   :  { %595 = vmatmul.f32.gmra.mxu1 %v1929_v57 }
  0x3f   :  { %251 = vmatmul.f32.gmra.mxu0 %v250_v22  ;;  %v2062_v22 = vand.u32 4294901760, %v147_v47 }
  0x41   :  { %3014 = vst [vmem:[#allocation17_spill] sm:$0xff] %v2062_v22  ;;  %v2079_v36 = vsub.f32 %v147_v47, %v2062_v22  ;;  %v273_v47 = vsub.f32 %v2068_v25, %v2895_v35  ;;  %v93_v35 = vsel %vm58_vm1, %v22_v4, 0  ;;  %v23_v4 = vld [vmem:[%s2883_s0 + $0x60] sm:$0xff] }
  0x42   :  { %419 = vmatmul.f32.gmra.mxu2 %v418_v0  ;;  %679 = vmatmul.f32.gmra.mxu3 %v1941_v61  ;;  %v41_v0 = vld [vmem:[%s2883_s0 + $0xf0] sm:$0xff]  ;;  %v2139_v10 = vand.u32 4294901760, %v93_v35  ;;  %v96_v6 = vsel %vm58_vm1, %v23_v4, 0  ;;  %v24_v4 = vld [vmem:[%s2883_s0 + $0x68] sm:$0xff] }
  0x43   :  { %3015 = vst [vmem:[#allocation18_spill] sm:$0xff] %v2079_v36  ;;  %v150_v12 = vsel %vm58_vm1, %v41_v0, 0  ;;  %v2894_v13 = vand.u32 4294901760, %v2079_v36  ;;  %v42_v0 = vld [vmem:[%s2883_s0 + $0xf8] sm:$0xff]  ;;  %v274_v51 = vand.u32 4294901760, %v273_v47  ;;  %v2124_v47 = vsub.f32 %v90_v30, %v2111_v1 }
  0x44   :  { %599 = vmatmul.f32.gmra.mxu1 %v1970_v8  ;;  %v2090_v56 = vand.u32 4294901760, %v150_v12  ;;  %v153_v38 = vsel %vm58_vm1, %v42_v0, 0  ;;  %v43_v0 = vld [vmem:[%s2883_s0 + $0x100] sm:$0xff]  ;;  %v2167_v23 = vand.u32 4294901760, %v96_v6  ;;  %v99_v2 = vsel %vm58_vm1, %v24_v4, 0  ;;  %v25_v4 = vld [vmem:[%s2883_s0 + $0x70] sm:$0xff] }
  0x45   :  { %v2902_v30 = vand.u32 4294901760, %v2124_v47  ;;  %v156_v44 = vsel %vm58_vm1, %v43_v0, 0  ;;  %v44_v0 = vld [vmem:[%s2883_s0 + $0x108] sm:$0xff] }
  0x46   :  { %3016 = vst [vmem:[#allocation19_spill] sm:$0xff] %v2090_v56  ;;  %v159_v54 = vsel %vm58_vm1, %v44_v0, 0  ;;  %v45_v0 = vld [vmem:[%s2883_s0 + $0x110] sm:$0xff] }
  0x47   :  { %259 = vmatmul.f32.gmra.mxu0 %v258_v42  ;;  %v266_v42 = vand.u32 4294901760, %v265_v11  ;;  %v2096_v11 = vsub.f32 %v87_v45, %v2083_v48 }
  0x49   :  { %v2896_v45 = vand.u32 4294901760, %v2096_v11 }
  0x4a   :  { %427 = vmatmul.f32.gmra.mxu2 %v426_v28  ;;  %683 = vmatmul.f32.gmra.mxu3 %v1978_v14  ;;  %v434_v28 = vand.u32 4294901760, %v433_v16  ;;  %v441_v16 = vsub.f32 %v2079_v36, %v2894_v13  ;;  %v2118_v13 = vand.u32 4294901760, %v153_v38 }
  0x4c   :  { %603 = vmatmul.f32.gmra.mxu1 %v1999_v15  ;;  %3018 = vst [vmem:[#allocation21_spill] sm:$0xff] %v2118_v13 }
  0x4f   :  { %267 = vmatmul.f32.gmra.mxu0 %v266_v42  ;;  %v2107_v42 = vsub.f32 %v150_v12, %v2090_v56  ;;  %v281_v12 = vsub.f32 %v2096_v11, %v2896_v45 }
  0x51   :  { %3017 = vst [vmem:[#allocation20_spill] sm:$0xff] %v2107_v42  ;;  %v2900_v34 = vand.u32 4294901760, %v2107_v42  ;;  %v282_v45 = vand.u32 4294901760, %v281_v12  ;;  %v2152_v12 = vsub.f32 %v93_v35, %v2139_v10 }
  0x52   :  { %435 = vmatmul.f32.gmra.mxu2 %v434_v28  ;;  %687 = vmatmul.f32.gmra.mxu3 %v2006_v9  ;;  %v442_v28 = vand.u32 4294901760, %v441_v16  ;;  %v2135_v16 = vsub.f32 %v153_v38, %v2118_v13  ;;  %v289_v38 = vsub.f32 %v2124_v47, %v2902_v30 }
  0x53   :  { %v2908_v35 = vand.u32 4294901760, %v2152_v12 }
  0x54   :  { %607 = vmatmul.f32.gmra.mxu1 %v2027_v63  ;;  %3019 = vst [vmem:[#allocation22_spill] sm:$0xff] %v2135_v16  ;;  %v2906_v41 = vand.u32 4294901760, %v2135_v16  ;;  %v290_v30 = vand.u32 4294901760, %v289_v38  ;;  %v2180_v38 = vsub.f32 %v96_v6, %v2167_v23 }
  0x56   :  { %v2918_v6 = vand.u32 4294901760, %v2180_v38 }
  0x57   :  { %275 = vmatmul.f32.gmra.mxu0 %v274_v51  ;;  %v449_v51 = vsub.f32 %v2107_v42, %v2900_v34  ;;  %v2146_v34 = vand.u32 4294901760, %v156_v44  ;;  %v2195_v42 = vand.u32 4294901760, %v99_v2 }
  0x59   :  { %3020 = vst [vmem:[#allocation23_spill] sm:$0xff] %v2146_v34 }
  0x5a   :  { %443 = vmatmul.f32.gmra.mxu2 %v442_v28  ;;  %691 = vmatmul.f32.gmra.mxu3 %v2034_v31  ;;  %v450_v28 = vand.u32 4294901760, %v449_v51  ;;  %v2163_v51 = vsub.f32 %v156_v44, %v2146_v34  ;;  %v297_v44 = vsub.f32 %v2152_v12, %v2908_v35 }
  0x5c   :  { %611 = vmatmul.f32.gmra.mxu1 %v2055_v24  ;;  %3021 = vst [vmem:[#allocation24_spill] sm:$0xff] %v2163_v51  ;;  %v2915_v18 = vand.u32 4294901760, %v2163_v51  ;;  %v298_v35 = vand.u32 4294901760, %v297_v44  ;;  %v2208_v44 = vsub.f32 %v99_v2, %v2195_v42 }
  0x5e   :  { %v2928_v2 = vand.u32 4294901760, %v2208_v44 }
  0x5f   :  { %283 = vmatmul.f32.gmra.mxu0 %v282_v45  ;;  %v457_v45 = vsub.f32 %v2135_v16, %v2906_v41  ;;  %v2174_v41 = vand.u32 4294901760, %v159_v54  ;;  %v162_v16 = vsel %vm58_vm1, %v45_v0, 0  ;;  %v46_v0 = vld [vmem:[%s2883_s0 + $0x118] sm:$0xff] }
  0x61   :  { %3022 = vst [vmem:[#allocation25_spill] sm:$0xff] %v2174_v41 }
  0x62   :  { %451 = vmatmul.f32.gmra.mxu2 %v450_v28  ;;  %695 = vmatmul.f32.gmra.mxu3 %v2062_v22  ;;  %v458_v28 = vand.u32 4294901760, %v457_v45  ;;  %v2191_v45 = vsub.f32 %v159_v54, %v2174_v41  ;;  %v305_v54 = vsub.f32 %v2180_v38, %v2918_v6  ;;  %v165_v22 = vsel %vm58_vm1, %v46_v0, 0  ;;  %v47_v0 = vld [vmem:[%s2883_s0 + $0x120] sm:$0xff] }
  0x63   :  { %v168_v31 = vsel %vm58_vm1, %v47_v0, 0  ;;  %v48_v0 = vld [vmem:[%s2883_s0 + $0x128] sm:$0xff] }
  0x64   :  { %615 = vmatmul.f32.gmra.mxu1 %v2083_v48  ;;  %3023 = vst [vmem:[#allocation26_spill] sm:$0xff] %v2191_v45  ;;  %v306_v6 = vand.u32 4294901760, %v305_v54  ;;  %v171_v9 = vsel %vm58_vm1, %v48_v0, 0  ;;  %v49_v0 = vld [vmem:[%s2883_s0 + $0x130] sm:$0xff] }
  0x65   :  { %v174_v14 = vsel %vm58_vm1, %v49_v0, 0  ;;  %v50_v0 = vld [vmem:[%s2883_s0 + $0x138] sm:$0xff] }
  0x66   :  { %v177_v61 = vsel %vm58_vm1, %v50_v0, 0 }
  0x67   :  { %291 = vmatmul.f32.gmra.mxu0 %v290_v30  ;;  %v465_v30 = vsub.f32 %v2163_v51, %v2915_v18  ;;  %v2202_v18 = vand.u32 4294901760, %v162_v16  ;;  %v102_v51 = vsel %vm58_vm1, %v25_v4, 0  ;;  %v26_v4 = vld [vmem:[%s2883_s0 + $0x78] sm:$0xff] }
  0x68   :  { %v2223_v36 = vand.u32 4294901760, %v102_v51 }
  0x69   :  { %3024 = vst [vmem:[#allocation27_spill] sm:$0xff] %v2202_v18 }
  0x6a   :  { %459 = vmatmul.f32.gmra.mxu2 %v458_v28  ;;  %699 = vmatmul.f32.gmra.mxu3 %v2090_v56  ;;  %v466_v28 = vand.u32 4294901760, %v465_v30  ;;  %v2925_v56 = vand.u32 4294901760, %v2191_v45  ;;  %v2219_v30 = vsub.f32 %v162_v16, %v2202_v18  ;;  %v313_v16 = vsub.f32 %v2208_v44, %v2928_v2 }
  0x6b   :  { %v2236_v54 = vsub.f32 %v102_v51, %v2223_v36 }
  0x6c   :  { %619 = vmatmul.f32.gmra.mxu1 %v2111_v1  ;;  %3025 = vst [vmem:[#allocation28_spill] sm:$0xff] %v2219_v30  ;;  %v314_v2 = vand.u32 4294901760, %v313_v16 }
  0x6d   :  { %v2938_v51 = vand.u32 4294901760, %v2236_v54 }
  0x6f   :  { %299 = vmatmul.f32.gmra.mxu0 %v298_v35  ;;  %v473_v35 = vsub.f32 %v2191_v45, %v2925_v56  ;;  %v2230_v56 = vand.u32 4294901760, %v165_v22  ;;  %v105_v45 = vsel %vm58_vm1, %v26_v4, 0  ;;  %v27_v4 = vld [vmem:[%s2883_s0 + $0x80] sm:$0xff] }
  0x70   :  { %v2251_v26 = vand.u32 4294901760, %v105_v45 }
  0x71   :  { %3026 = vst [vmem:[#allocation29_spill] sm:$0xff] %v2230_v56 }
  0x72   :  { %467 = vmatmul.f32.gmra.mxu2 %v466_v28  ;;  %703 = vmatmul.f32.gmra.mxu3 %v2118_v13  ;;  %v474_v28 = vand.u32 4294901760, %v473_v35  ;;  %v2935_v13 = vand.u32 4294901760, %v2219_v30  ;;  %v2247_v35 = vsub.f32 %v165_v22, %v2230_v56  ;;  %v321_v22 = vsub.f32 %v2236_v54, %v2938_v51 }
  0x73   :  { %v2264_v16 = vsub.f32 %v105_v45, %v2251_v26 }
  0x74   :  { %623 = vmatmul.f32.gmra.mxu1 %v2139_v10  ;;  %3027 = vst [vmem:[#allocation30_spill] sm:$0xff] %v2247_v35  ;;  %v322_v51 = vand.u32 4294901760, %v321_v22 }
  0x75   :  { %v2948_v45 = vand.u32 4294901760, %v2264_v16 }
  0x77   :  { %307 = vmatmul.f32.gmra.mxu0 %v306_v6  ;;  %v481_v6 = vsub.f32 %v2219_v30, %v2935_v13  ;;  %v2258_v13 = vand.u32 4294901760, %v168_v31  ;;  %v108_v30 = vsel %vm58_vm1, %v27_v4, 0  ;;  %v28_v4 = vld [vmem:[%s2883_s0 + $0x88] sm:$0xff] }
  0x78   :  { %v2279_v5 = vand.u32 4294901760, %v108_v30 }
  0x79   :  { %3028 = vst [vmem:[#allocation31_spill] sm:$0xff] %v2258_v13 }
  0x7a   :  { %475 = vmatmul.f32.gmra.mxu2 %v474_v28  ;;  %707 = vmatmul.f32.gmra.mxu3 %v2146_v34  ;;  %v482_v28 = vand.u32 4294901760, %v481_v6  ;;  %v2945_v34 = vand.u32 4294901760, %v2247_v35  ;;  %v2275_v6 = vsub.f32 %v168_v31, %v2258_v13  ;;  %v329_v31 = vsub.f32 %v2264_v16, %v2948_v45 }
  0x7b   :  { %v2292_v22 = vsub.f32 %v108_v30, %v2279_v5 }
  0x7c   :  { %627 = vmatmul.f32.gmra.mxu1 %v2167_v23  ;;  %3029 = vst [vmem:[#allocation32_spill] sm:$0xff] %v2275_v6  ;;  %v330_v45 = vand.u32 4294901760, %v329_v31 }
  0x7d   :  { %v2958_v30 = vand.u32 4294901760, %v2292_v22 }
  0x7f   :  { %315 = vmatmul.f32.gmra.mxu0 %v314_v2  ;;  %v489_v2 = vsub.f32 %v2247_v35, %v2945_v34  ;;  %v2286_v34 = vand.u32 4294901760, %v171_v9  ;;  %v111_v35 = vsel %vm58_vm1, %v28_v4, 0  ;;  %v29_v4 = vld [vmem:[%s2883_s0 + $0x90] sm:$0xff] }
  0x80   :  { %v2307_v40 = vand.u32 4294901760, %v111_v35 }
  0x81   :  { %3030 = vst [vmem:[#allocation33_spill] sm:$0xff] %v2286_v34 }
  0x82   :  { %483 = vmatmul.f32.gmra.mxu2 %v482_v28  ;;  %711 = vmatmul.f32.gmra.mxu3 %v2174_v41  ;;  %v490_v28 = vand.u32 4294901760, %v489_v2  ;;  %v2955_v41 = vand.u32 4294901760, %v2275_v6  ;;  %v2303_v2 = vsub.f32 %v171_v9, %v2286_v34  ;;  %v337_v9 = vsub.f32 %v2292_v22, %v2958_v30 }
  0x83   :  { %v2320_v31 = vsub.f32 %v111_v35, %v2307_v40 }
  0x84   :  { %631 = vmatmul.f32.gmra.mxu1 %v2195_v42  ;;  %3031 = vst [vmem:[#allocation34_spill] sm:$0xff] %v2303_v2  ;;  %v338_v30 = vand.u32 4294901760, %v337_v9 }
  0x85   :  { %v2974_v35 = vand.u32 4294901760, %v2320_v31 }
  0x87   :  { %323 = vmatmul.f32.gmra.mxu0 %v322_v51  ;;  %v497_v51 = vsub.f32 %v2275_v6, %v2955_v41  ;;  %v2314_v41 = vand.u32 4294901760, %v174_v14  ;;  %v114_v6 = vsel %vm58_vm1, %v29_v4, 0  ;;  %v345_v9 = vsub.f32 %v2320_v31, %v2974_v35 }
  0x88   :  { %v2335_v37 = vand.u32 4294901760, %v114_v6 }
  0x89   :  { %3032 = vst [vmem:[#allocation35_spill] sm:$0xff] %v2314_v41  ;;  %v346_v39 = vand.u32 4294901760, %v345_v9 }
  0x8a   :  { %491 = vmatmul.f32.gmra.mxu2 %v490_v28  ;;  %715 = vmatmul.f32.gmra.mxu3 %v2202_v18  ;;  %v498_v28 = vand.u32 4294901760, %v497_v51  ;;  %v2965_v18 = vand.u32 4294901760, %v2303_v2  ;;  %v2331_v51 = vsub.f32 %v174_v14, %v2314_v41  ;;  %v2350_v0 = vsub.f32 %v114_v6, %v2335_v37 }
  0x8c   :  { %635 = vmatmul.f32.gmra.mxu1 %v2223_v36  ;;  %3033 = vst [vmem:[#allocation36_spill] sm:$0xff] %v2331_v51  ;;  %v2983_v14 = vand.u32 4294901760, %v2331_v51  ;;  %v2984_v35 = vand.u32 4294901760, %v2350_v0 }
  0x8f   :  { %331 = vmatmul.f32.gmra.mxu0 %v330_v45  ;;  %v505_v45 = vsub.f32 %v2303_v2, %v2965_v18  ;;  %v2344_v2 = vand.u32 4294901760, %v177_v61 }
  0x91   :  { %v506_v18 = vand.u32 4294901760, %v505_v45  ;;  %3034 = vst [vmem:[#allocation37_spill] sm:$0xff] %v2344_v2  ;;  %v513_v45 = vsub.f32 %v2331_v51, %v2983_v14 }
  0x92   :  { %499 = vmatmul.f32.gmra.mxu2 %v498_v28  ;;  %719 = vmatmul.f32.gmra.mxu3 %v2230_v56  ;;  %v30_v56 = vld [vmem:[%s2883_s0 + $0x98] sm:$0xff] }
  0x93   :  { %v117_v52 = vsel %vm58_vm1, %v30_v56, 0 }
  0x94   :  { %639 = vmatmul.f32.gmra.mxu1 %v2251_v26  ;;  %v2338_v4 = vpop.f32.mrf.mxu0  ;;  %v2363_v43 = vand.u32 4294901760, %v117_v52 }
  0x95   :  { %v372_v28 = vpop.f32.mrf.mxu2 }
  0x96   :  { %v2375_v9 = vsub.f32 %v117_v52, %v2363_v43 }
  0x97   :  { %339 = vmatmul.f32.gmra.mxu0 %v338_v30  ;;  %v2360_v30 = vsub.f32 %v177_v61, %v2344_v2  ;;  %v353_v61 = vsub.f32 %v2350_v0, %v2984_v35 }
  0x99   :  { %v2353_v21 = vpop.f32.mrf.mxu1  ;;  %3035 = vst [vmem:[#allocation38_spill] sm:$0xff] %v2360_v30  ;;  %v2989_v7 = vand.u32 4294901760, %v2360_v30 }
  0x9a   :  { %507 = vmatmul.f32.gmra.mxu2 %v506_v18  ;;  %723 = vmatmul.f32.gmra.mxu3 %v2258_v13  ;;  %v514_v13 = vand.u32 4294901760, %v513_v45  ;;  %v354_v45 = vand.u32 4294901760, %v353_v61 }
  0x9c   :  { %643 = vmatmul.f32.gmra.mxu1 %v2279_v5  ;;  %v2366_v56 = vpop.f32.mrf.mxu0 }
  0x9d   :  { %v380_v6 = vpop.f32.mrf.mxu2  ;;  %v660_v18 = vpop.f32.mrf.mxu3 }
  0x9e   :  { %v2368_v55 = vadd.f32 %v660_v18, %v372_v28  ;;  %v521_v28 = vsub.f32 %v2360_v30, %v2989_v7  ;;  %v2994_v18 = vand.u32 4294901760, %v2375_v9 }
  0x9f   :  { %347 = vmatmul.f32.gmra.mxu0 %v346_v39 }
  0xa0   :  { %3036 = vst [vmem:[#allocation39_spill] sm:$0xff] %v2368_v55  ;;  %v522_v55 = vand.u32 4294901760, %v521_v28 }
  0xa1   :  { %v2377_v14 = vpop.f32.mrf.mxu1 }
  0xa2   :  { %515 = vmatmul.f32.gmra.mxu2 %v514_v13  ;;  %727 = vmatmul.f32.gmra.mxu3 %v2286_v34  ;;  %v361_v13 = vsub.f32 %v2375_v9, %v2994_v18 }
  0xa4   :  { %647 = vmatmul.f32.gmra.mxu1 %v2307_v40  ;;  %v2385_v39 = vpop.f32.mrf.mxu0  ;;  %v362_v61 = vand.u32 4294901760, %v361_v13 }
  0xa5   :  { %v388_v35 = vpop.f32.mrf.mxu2  ;;  %v664_v51 = vpop.f32.mrf.mxu3 }
  0xa6   :  { %v2387_v52 = vadd.f32 %v664_v51, %v380_v6 }
  0xa7   :  { %355 = vmatmul.f32.gmra.mxu0 %v354_v45 }
  0xa8   :  { %3037 = vst [vmem:[#allocation40_spill] sm:$0xff] %v2387_v52 }
  0xa9   :  { %v2392_v34 = vpop.f32.mrf.mxu1 }
  0xaa   :  { %523 = vmatmul.f32.gmra.mxu2 %v522_v55  ;;  %731 = vmatmul.f32.gmra.mxu3 %v2314_v41 }
  0xac   :  { %651 = vmatmul.f32.gmra.mxu1 %v2335_v37  ;;  %v2396_v7 = vpop.f32.mrf.mxu0 }
  0xad   :  { %v396_v30 = vpop.f32.mrf.mxu2  ;;  %v668_v49 = vpop.f32.mrf.mxu3 }
  0xae   :  { %v2398_v51 = vadd.f32 %v668_v49, %v388_v35  ;;  %v3040_v49 = vand.u32 4294901760, %v1823_v59 }
  0xaf   :  { %363 = vmatmul.f32.gmra.mxu0 %v362_v61 }
  0xb0   :  { %3038 = vst [vmem:[#allocation41_spill] sm:$0xff] %v2398_v51 }
  0xb1   :  { %v2400_v6 = vpop.f32.mrf.mxu1 }
  0xb2   :  { %735 = vmatmul.f32.gmra.mxu3 %v2344_v2  ;;  %771 = vmatmul.f32.vlgmr.msrb.gmra.mxu2 %v1823_v59 }
  0xb4   :  { %655 = vmatmul.f32.gmra.mxu1 %v2363_v43  ;;  %v2405_v55 = vpop.f32.mrf.mxu0 }
  0xb5   :  { %v404_v28 = vpop.f32.mrf.mxu2  ;;  %v672_v45 = vpop.f32.mrf.mxu3 }
  0xb6   :  { %v2407_v13 = vadd.f32 %v672_v45, %v396_v30  ;;  %v3042_v45 = vand.u32 4294901760, %v1839_v3 }
  0xb7   :  { %1272 = vmatmul.f32.vlgmr.msrb.gmra.mxu0 %v1805_v50 }
  0xb8   :  { %3039 = vst [vmem:[#allocation42_spill] sm:$0xff] %v2407_v13 }
  0xb9   :  { %v2410_v18 = vpop.f32.mrf.mxu1 }
  0xba   :  { %776 = vmatmul.f32.gmra.mxu2 %v1839_v3  ;;  %996 = vmatmul.f32.vlgmr.msrb.gmra.mxu3 %v3040_v49 }
  0xbc   :  { %1456 = vmatmul.f32.vlgmr.msrb.gmra.mxu1 %v1805_v50  ;;  %v2416_v35 = vpop.f32.mrf.mxu0 }
  0xbd   :  { %v412_v61 = vpop.f32.mrf.mxu2  ;;  %v676_v2 = vpop.f32.mrf.mxu3 }
  0xbe   :  { %v2418_v51 = vadd.f32 %v676_v2, %v404_v28  ;;  %v3044_v28 = vand.u32 4294901760, %v1869_v19 }
  0xbf   :  { %1276 = vmatmul.f32.gmra.mxu0 %v1825_v60 }
  0xc0   :  { %3041 = vst [vmem:[#allocation43_spill] sm:$0xff] %v2418_v51 }
  0xc1   :  { %v2421_v30 = vpop.f32.mrf.mxu1 }
  0xc2   :  { %781 = vmatmul.f32.gmra.mxu2 %v1869_v19  ;;  %1002 = vmatmul.f32.gmra.mxu3 %v3042_v45 }
  0xc4   :  { %1460 = vmatmul.f32.gmra.mxu1 %v1825_v60  ;;  %v2427_v59 = vpop.f32.mrf.mxu0 }
  0xc5   :  { %v420_v50 = vpop.f32.mrf.mxu2  ;;  %v680_v49 = vpop.f32.mrf.mxu3 }
  0xc6   :  { %v2429_v13 = vadd.f32 %v680_v49, %v412_v61  ;;  %v3046_v49 = vand.u32 4294901760, %v1908_v17 }
  0xc7   :  { %1280 = vmatmul.f32.gmra.mxu0 %v1853_v29 }
  0xc8   :  { %3043 = vst [vmem:[#allocation44_spill] sm:$0xff] %v2429_v13 }
  0xc9   :  { %v2432_v2 = vpop.f32.mrf.mxu1 }
  0xca   :  { %786 = vmatmul.f32.gmra.mxu2 %v1908_v17  ;;  %1008 = vmatmul.f32.gmra.mxu3 %v3044_v28 }
  0xcc   :  { %1464 = vmatmul.f32.gmra.mxu1 %v1853_v29  ;;  %v2438_v3 = vpop.f32.mrf.mxu0 }
  0xcd   :  { %v428_v60 = vpop.f32.mrf.mxu2  ;;  %v684_v45 = vpop.f32.mrf.mxu3 }
  0xce   :  { %v2440_v51 = vadd.f32 %v684_v45, %v420_v50  ;;  %v3048_v45 = vand.u32 4294901760, %v1950_v62 }
  0xcf   :  { %1284 = vmatmul.f32.gmra.mxu0 %v1888_v46 }
  0xd0   :  { %3045 = vst [vmem:[#allocation45_spill] sm:$0xff] %v2440_v51 }
  0xd1   :  { %v2443_v61 = vpop.f32.mrf.mxu1 }
  0xd2   :  { %791 = vmatmul.f32.gmra.mxu2 %v1950_v62  ;;  %1014 = vmatmul.f32.gmra.mxu3 %v3046_v49 }
  0xd4   :  { %1468 = vmatmul.f32.gmra.mxu1 %v1888_v46  ;;  %v2449_v19 = vpop.f32.mrf.mxu0 }
  0xd5   :  { %v436_v29 = vpop.f32.mrf.mxu2  ;;  %v688_v28 = vpop.f32.mrf.mxu3 }
  0xd6   :  { %v2451_v13 = vadd.f32 %v688_v28, %v428_v60  ;;  %v3050_v28 = vand.u32 4294901760, %v1984_v33 }
  0xd7   :  { %1288 = vmatmul.f32.gmra.mxu0 %v1929_v57 }
  0xd8   :  { %3047 = vst [vmem:[#allocation46_spill] sm:$0xff] %v2451_v13 }
  0xd9   :  { %v2454_v50 = vpop.f32.mrf.mxu1 }
  0xda   :  { %796 = vmatmul.f32.gmra.mxu2 %v1984_v33  ;;  %1020 = vmatmul.f32.gmra.mxu3 %v3048_v45 }
  0xdc   :  { %1472 = vmatmul.f32.gmra.mxu1 %v1929_v57  ;;  %v2460_v17 = vpop.f32.mrf.mxu0 }
  0xdd   :  { %v444_v46 = vpop.f32.mrf.mxu2  ;;  %v692_v49 = vpop.f32.mrf.mxu3 }
  0xde   :  { %v2462_v51 = vadd.f32 %v692_v49, %v436_v29  ;;  %v3052_v49 = vand.u32 4294901760, %v2012_v53 }
  0xdf   :  { %1292 = vmatmul.f32.gmra.mxu0 %v1970_v8 }
  0xe0   :  { %3049 = vst [vmem:[#allocation47_spill] sm:$0xff] %v2462_v51 }
  0xe1   :  { %v2465_v60 = vpop.f32.mrf.mxu1 }
  0xe2   :  { %801 = vmatmul.f32.gmra.mxu2 %v2012_v53  ;;  %1026 = vmatmul.f32.gmra.mxu3 %v3050_v28 }
  0xe4   :  { %1476 = vmatmul.f32.gmra.mxu1 %v1970_v8  ;;  %v2471_v62 = vpop.f32.mrf.mxu0 }
  0xe5   :  { %v452_v57 = vpop.f32.mrf.mxu2  ;;  %v696_v45 = vpop.f32.mrf.mxu3 }
  0xe6   :  { %v2473_v13 = vadd.f32 %v696_v45, %v444_v46  ;;  %v3054_v45 = vand.u32 4294901760, %v2040_v32 }
  0xe7   :  { %1296 = vmatmul.f32.gmra.mxu0 %v1999_v15 }
  0xe8   :  { %3051 = vst [vmem:[#allocation48_spill] sm:$0xff] %v2473_v13 }
  0xe9   :  { %v2476_v29 = vpop.f32.mrf.mxu1 }
  0xea   :  { %806 = vmatmul.f32.gmra.mxu2 %v2040_v32  ;;  %1032 = vmatmul.f32.gmra.mxu3 %v3052_v49 }
  0xec   :  { %1480 = vmatmul.f32.gmra.mxu1 %v1999_v15  ;;  %v2482_v33 = vpop.f32.mrf.mxu0 }
  0xed   :  { %v460_v8 = vpop.f32.mrf.mxu2  ;;  %v700_v28 = vpop.f32.mrf.mxu3 }
  0xee   :  { %v2484_v51 = vadd.f32 %v700_v28, %v452_v57  ;;  %v3056_v28 = vand.u32 4294901760, %v2068_v25 }
  0xef   :  { %1300 = vmatmul.f32.gmra.mxu0 %v2027_v63 }
  0xf0   :  { %3053 = vst [vmem:[#allocation49_spill] sm:$0xff] %v2484_v51 }
  0xf1   :  { %v2487_v46 = vpop.f32.mrf.mxu1 }
  0xf2   :  { %811 = vmatmul.f32.gmra.mxu2 %v2068_v25  ;;  %1038 = vmatmul.f32.gmra.mxu3 %v3054_v45 }
  0xf4   :  { %1484 = vmatmul.f32.gmra.mxu1 %v2027_v63  ;;  %v2493_v53 = vpop.f32.mrf.mxu0 }
  0xf5   :  { %v468_v15 = vpop.f32.mrf.mxu2  ;;  %v704_v49 = vpop.f32.mrf.mxu3 }
  0xf6   :  { %v2495_v13 = vadd.f32 %v704_v49, %v460_v8  ;;  %v3058_v49 = vand.u32 4294901760, %v2096_v11 }
  0xf7   :  { %1304 = vmatmul.f32.gmra.mxu0 %v2055_v24 }
  0xf8   :  { %3055 = vst [vmem:[#allocation50_spill] sm:$0xff] %v2495_v13 }
  0xf9   :  { %v2498_v57 = vpop.f32.mrf.mxu1 }
  0xfa   :  { %816 = vmatmul.f32.gmra.mxu2 %v2096_v11  ;;  %1044 = vmatmul.f32.gmra.mxu3 %v3056_v28 }
  0xfc   :  { %1488 = vmatmul.f32.gmra.mxu1 %v2055_v24  ;;  %v2504_v32 = vpop.f32.mrf.mxu0 }
  0xfd   :  { %v476_v63 = vpop.f32.mrf.mxu2  ;;  %v708_v45 = vpop.f32.mrf.mxu3 }
  0xfe   :  { %v2506_v51 = vadd.f32 %v708_v45, %v468_v15  ;;  %v3060_v45 = vand.u32 4294901760, %v2124_v47 }
  0xff   :  { %1308 = vmatmul.f32.gmra.mxu0 %v2083_v48 }
 0x100   :  { %3057 = vst [vmem:[#allocation51_spill] sm:$0xff] %v2506_v51 }
 0x101   :  { %v2509_v8 = vpop.f32.mrf.mxu1 }
 0x102   :  { %821 = vmatmul.f32.gmra.mxu2 %v2124_v47  ;;  %1050 = vmatmul.f32.gmra.mxu3 %v3058_v49 }
 0x104   :  { %1492 = vmatmul.f32.gmra.mxu1 %v2083_v48  ;;  %v2515_v25 = vpop.f32.mrf.mxu0 }
 0x105   :  { %v484_v24 = vpop.f32.mrf.mxu2  ;;  %v712_v28 = vpop.f32.mrf.mxu3 }
 0x106   :  { %v2517_v13 = vadd.f32 %v712_v28, %v476_v63  ;;  %v3062_v28 = vand.u32 4294901760, %v2152_v12 }
 0x107   :  { %1312 = vmatmul.f32.gmra.mxu0 %v2111_v1 }
 0x108   :  { %3059 = vst [vmem:[#allocation52_spill] sm:$0xff] %v2517_v13 }
 0x109   :  { %v2520_v15 = vpop.f32.mrf.mxu1 }
 0x10a   :  { %826 = vmatmul.f32.gmra.mxu2 %v2152_v12  ;;  %1056 = vmatmul.f32.gmra.mxu3 %v3060_v45 }
 0x10c   :  { %1496 = vmatmul.f32.gmra.mxu1 %v2111_v1  ;;  %v2526_v11 = vpop.f32.mrf.mxu0 }
 0x10d   :  { %v492_v48 = vpop.f32.mrf.mxu2  ;;  %v716_v49 = vpop.f32.mrf.mxu3 }
 0x10e   :  { %v2528_v51 = vadd.f32 %v716_v49, %v484_v24  ;;  %v3064_v49 = vand.u32 4294901760, %v2180_v38 }
 0x10f   :  { %1316 = vmatmul.f32.gmra.mxu0 %v2139_v10 }
 0x110   :  { %3061 = vst [vmem:[#allocation53_spill] sm:$0xff] %v2528_v51 }
 0x111   :  { %v2531_v63 = vpop.f32.mrf.mxu1 }
 0x112   :  { %831 = vmatmul.f32.gmra.mxu2 %v2180_v38  ;;  %1062 = vmatmul.f32.gmra.mxu3 %v3062_v28 }
 0x114   :  { %1500 = vmatmul.f32.gmra.mxu1 %v2139_v10  ;;  %v2537_v47 = vpop.f32.mrf.mxu0 }
 0x115   :  { %v500_v1 = vpop.f32.mrf.mxu2  ;;  %v720_v45 = vpop.f32.mrf.mxu3 }
 0x116   :  { %v2539_v13 = vadd.f32 %v720_v45, %v492_v48  ;;  %v3066_v45 = vand.u32 4294901760, %v2208_v44 }
 0x117   :  { %1320 = vmatmul.f32.gmra.mxu0 %v2167_v23 }
 0x118   :  { %3063 = vst [vmem:[#allocation54_spill] sm:$0xff] %v2539_v13 }
 0x119   :  { %v2542_v24 = vpop.f32.mrf.mxu1 }
 0x11a   :  { %836 = vmatmul.f32.gmra.mxu2 %v2208_v44  ;;  %1068 = vmatmul.f32.gmra.mxu3 %v3064_v49 }
 0x11c   :  { %1504 = vmatmul.f32.gmra.mxu1 %v2167_v23  ;;  %v2548_v12 = vpop.f32.mrf.mxu0 }
 0x11d   :  { %v508_v10 = vpop.f32.mrf.mxu2  ;;  %v724_v28 = vpop.f32.mrf.mxu3 }
 0x11e   :  { %v2550_v51 = vadd.f32 %v724_v28, %v500_v1  ;;  %v3068_v28 = vand.u32 4294901760, %v2236_v54 }
 0x11f   :  { %1324 = vmatmul.f32.gmra.mxu0 %v2195_v42 }
 0x120   :  { %3065 = vst [vmem:[#allocation55_spill] sm:$0xff] %v2550_v51 }
 0x121   :  { %v2553_v48 = vpop.f32.mrf.mxu1 }
 0x122   :  { %841 = vmatmul.f32.gmra.mxu2 %v2236_v54  ;;  %1074 = vmatmul.f32.gmra.mxu3 %v3066_v45 }
 0x124   :  { %1508 = vmatmul.f32.gmra.mxu1 %v2195_v42  ;;  %v2559_v38 = vpop.f32.mrf.mxu0 }
 0x125   :  { %v516_v23 = vpop.f32.mrf.mxu2  ;;  %v728_v49 = vpop.f32.mrf.mxu3 }
 0x126   :  { %v2561_v13 = vadd.f32 %v728_v49, %v508_v10  ;;  %v3070_v49 = vand.u32 4294901760, %v2264_v16 }
 0x127   :  { %1328 = vmatmul.f32.gmra.mxu0 %v2223_v36 }
 0x128   :  { %3067 = vst [vmem:[#allocation56_spill] sm:$0xff] %v2561_v13 }
 0x129   :  { %v2564_v1 = vpop.f32.mrf.mxu1 }
 0x12a   :  { %846 = vmatmul.f32.gmra.mxu2 %v2264_v16  ;;  %1080 = vmatmul.f32.gmra.mxu3 %v3068_v28 }
 0x12c   :  { %1512 = vmatmul.f32.gmra.mxu1 %v2223_v36  ;;  %v2570_v44 = vpop.f32.mrf.mxu0 }
 0x12d   :  { %v524_v42 = vpop.f32.mrf.mxu2  ;;  %v732_v45 = vpop.f32.mrf.mxu3 }
 0x12e   :  { %v2572_v51 = vadd.f32 %v732_v45, %v516_v23  ;;  %v581_v45 = vadd.f32 %v2353_v21, %v2338_v4 }
 0x12f   :  { %1332 = vmatmul.f32.gmra.mxu0 %v2251_v26 }
 0x130   :  { %3069 = vst [vmem:[#allocation57_spill] sm:$0xff] %v2572_v51  ;;  %v3072_v51 = vand.u32 4294901760, %v2292_v22 }
 0x131   :  { %v2575_v10 = vpop.f32.mrf.mxu1 }
 0x132   :  { %851 = vmatmul.f32.gmra.mxu2 %v2292_v22  ;;  %1086 = vmatmul.f32.gmra.mxu3 %v3070_v49  ;;  %v3073_v22 = vand.u32 4294901760, %v2320_v31 }
 0x134   :  { %1516 = vmatmul.f32.gmra.mxu1 %v2251_v26  ;;  %v1273_v54 = vpop.f32.mrf.mxu0 }
 0x135   :  { %v736_v28 = vpop.f32.mrf.mxu3  ;;  %v772_v36 = vpop.f32.mrf.mxu2 }
 0x136   :  { %v2581_v13 = vadd.f32 %v736_v28, %v524_v42  ;;  %v773_v16 = vadd.f32 %v772_v36, %v581_v45 }
 0x137   :  { %1336 = vmatmul.f32.gmra.mxu0 %v2279_v5 }
 0x138   :  { %3071 = vst [vmem:[#allocation58_spill] sm:$0xff] %v2581_v13  ;;  %v585_v13 = vadd.f32 %v2377_v14, %v2366_v56 }
 0x139   :  { %v1457_v23 = vpop.f32.mrf.mxu1 }
 0x13a   :  { %856 = vmatmul.f32.gmra.mxu2 %v2320_v31  ;;  %1092 = vmatmul.f32.gmra.mxu3 %v3072_v51 }
 0x13c   :  { %1520 = vmatmul.f32.gmra.mxu1 %v2279_v5  ;;  %v1277_v26 = vpop.f32.mrf.mxu0 }
 0x13d   :  { %v777_v49 = vpop.f32.mrf.mxu2  ;;  %v997_v41 = vpop.f32.mrf.mxu3 }
 0x13e   :  { %v998_v52 = vadd.f32 %v997_v41, %v773_v16  ;;  %v778_v4 = vadd.f32 %v777_v49, %v585_v13  ;;  %v3074_v13 = vand.u32 4294901760, %v2350_v0  ;;  %v3075_v49 = vand.u32 4294901760, %v2375_v9 }
 0x13f   :  { %1340 = vmatmul.f32.gmra.mxu0 %v2307_v40 }
 0x140   :  { %v1274_v42 = vadd.f32 %v1273_v54, %v998_v52  ;;  %v589_v54 = vadd.f32 %v2392_v34, %v2385_v39 }
 0x141   :  { %v1461_v28 = vpop.f32.mrf.mxu1 }
 0x142   :  { %v1458_v21 = vadd.f32 %v1457_v23, %v1274_v42  ;;  %861 = vmatmul.f32.gmra.mxu2 %v2350_v0  ;;  %1098 = vmatmul.f32.gmra.mxu3 %v3073_v22 }
 0x144   :  { %1616 = vst [vmem:[%s2884_s2] sm:$0xff] %v1458_v21  ;;  %1524 = vmatmul.f32.gmra.mxu1 %v2307_v40  ;;  %v1281_v41 = vpop.f32.mrf.mxu0 }
 0x145   :  { %v782_v5 = vpop.f32.mrf.mxu2  ;;  %v1003_v52 = vpop.f32.mrf.mxu3 }
 0x146   :  { %v1004_v51 = vadd.f32 %v1003_v52, %v778_v4  ;;  %v783_v36 = vadd.f32 %v782_v5, %v589_v54  ;;  %v597_v4 = vadd.f32 %v2410_v18, %v2405_v55  ;;  %v601_v54 = vadd.f32 %v2421_v30, %v2416_v35 }
 0x147   :  { %1344 = vmatmul.f32.gmra.mxu0 %v2335_v37 }
 0x148   :  { %v1278_v14 = vadd.f32 %v1277_v26, %v1004_v51  ;;  %v593_v26 = vadd.f32 %v2400_v6, %v2396_v7 }
 0x149   :  { %v1465_v56 = vpop.f32.mrf.mxu1 }
 0x14a   :  { %v1462_v31 = vadd.f32 %v1461_v28, %v1278_v14  ;;  %866 = vmatmul.f32.gmra.mxu2 %v2375_v9  ;;  %1104 = vmatmul.f32.gmra.mxu3 %v3074_v13  ;;  %v3079_v13 = vand.u32 4294901760, %v1820_v58 }
 0x14c   :  { %1617 = vst [vmem:[%s2884_s2 + $0x8] sm:$0xff] %v1462_v31  ;;  %1528 = vmatmul.f32.gmra.mxu1 %v2335_v37  ;;  %v1285_v40 = vpop.f32.mrf.mxu0  ;;  %v3078_v31 = vld [vmem:[#allocation4_spill] sm:$0xff] }
 0x14d   :  { %v787_v23 = vpop.f32.mrf.mxu2  ;;  %v1009_v45 = vpop.f32.mrf.mxu3 }
 0x14e   :  { %v1010_v16 = vadd.f32 %v1009_v45, %v783_v36  ;;  %v788_v42 = vadd.f32 %v787_v23, %v593_v26  ;;  %v3082_v26 = vand.u32 4294901760, %v3078_v31 }
 0x14f   :  { %1348 = vmatmul.f32.gmra.mxu0 %v2363_v43 }
 0x150   :  { %v1282_v34 = vadd.f32 %v1281_v41, %v1010_v16  ;;  %v3076_v41 = vand.u32 4294901760, %v1755_v27  ;;  %v3080_v16 = vld [vmem:[#allocation3_spill] sm:$0xff] }
 0x151   :  { %v1469_v39 = vpop.f32.mrf.mxu1 }
 0x152   :  { %v1466_v0 = vadd.f32 %v1465_v56, %v1282_v34  ;;  %871 = vmatmul.f32.gmra.mxu2 %v1755_v27  ;;  %1110 = vmatmul.f32.gmra.mxu3 %v3075_v49  ;;  %v3077_v56 = vld [vmem:[#allocation2_spill] sm:$0xff]  ;;  %v605_v34 = vadd.f32 %v2432_v2, %v2427_v59 }
 0x154   :  { %1618 = vst [vmem:[%s2884_s2 + $0x10] sm:$0xff] %v1466_v0  ;;  %1532 = vmatmul.f32.gmra.mxu1 %v2363_v43  ;;  %v1289_v37 = vpop.f32.mrf.mxu0 }
 0x155   :  { %v792_v28 = vpop.f32.mrf.mxu2  ;;  %v1015_v21 = vpop.f32.mrf.mxu3 }
 0x156   :  { %v1016_v22 = vadd.f32 %v1015_v21, %v788_v42  ;;  %v793_v5 = vadd.f32 %v792_v28, %v597_v4  ;;  %v3083_v21 = vld [vmem:[#allocation5_spill] sm:$0xff] }
 0x157   :  { %1352 = vmatmul.f32.gmra.mxu0 %v1738_v20 }
 0x158   :  { %v1286_v7 = vadd.f32 %v1285_v40, %v1016_v22  ;;  %v609_v22 = vadd.f32 %v2443_v61, %v2438_v3 }
 0x159   :  { %v1473_v6 = vpop.f32.mrf.mxu1 }
 0x15a   :  { %v1470_v9 = vadd.f32 %v1469_v39, %v1286_v7  ;;  %876 = vmatmul.f32.gmra.mxu2 %v1820_v58  ;;  %1116 = vmatmul.f32.gmra.mxu3 %v3076_v41  ;;  %v3081_v39 = vld [vmem:[#allocation6_spill] sm:$0xff] }
 0x15b   :  { %v3085_v4 = vand.u32 4294901760, %v3081_v39 }
 0x15c   :  { %1619 = vst [vmem:[%s2884_s2 + $0x18] sm:$0xff] %v1470_v9  ;;  %1536 = vmatmul.f32.gmra.mxu1 %v1738_v20  ;;  %v1293_v43 = vpop.f32.mrf.mxu0 }
 0x15d   :  { %v797_v52 = vpop.f32.mrf.mxu2  ;;  %v1021_v51 = vpop.f32.mrf.mxu3 }
 0x15e   :  { %v1022_v14 = vadd.f32 %v1021_v51, %v793_v5  ;;  %v798_v36 = vadd.f32 %v797_v52, %v601_v54  ;;  %v3086_v51 = vld [vmem:[#allocation7_spill] sm:$0xff] }
 0x15f   :  { %1356 = vmatmul.f32.gmra.mxu0 %v3077_v56 }
 0x160   :  { %v1290_v18 = vadd.f32 %v1289_v37, %v1022_v14  ;;  %v613_v14 = vadd.f32 %v2454_v50, %v2449_v19 }
 0x161   :  { %v1477_v55 = vpop.f32.mrf.mxu1 }
 0x162   :  { %v1474_v27 = vadd.f32 %v1473_v6, %v1290_v18  ;;  %881 = vmatmul.f32.gmra.mxu2 %v3078_v31  ;;  %1122 = vmatmul.f32.gmra.mxu3 %v3079_v13  ;;  %v3084_v6 = vld [vmem:[#allocation8_spill] sm:$0xff]  ;;  %v3087_v18 = vld [vmem:[#allocation10_spill] sm:$0xff] }
 0x164   :  { %1620 = vst [vmem:[%s2884_s2 + $0x20] sm:$0xff] %v1474_v27  ;;  %1540 = vmatmul.f32.gmra.mxu1 %v3077_v56  ;;  %v1297_v20 = vpop.f32.mrf.mxu0 }
 0x165   :  { %v802_v40 = vpop.f32.mrf.mxu2  ;;  %v1027_v23 = vpop.f32.mrf.mxu3 }
 0x166   :  { %v1028_v45 = vadd.f32 %v1027_v23, %v798_v36  ;;  %v803_v0 = vadd.f32 %v802_v40, %v605_v34  ;;  %v617_v40 = vadd.f32 %v2465_v60, %v2460_v17 }
 0x167   :  { %1360 = vmatmul.f32.gmra.mxu0 %v3080_v16 }
 0x168   :  { %v1294_v35 = vadd.f32 %v1293_v43, %v1028_v45  ;;  %v3090_v45 = vld [vmem:[#allocation12_spill] sm:$0xff] }
 0x169   :  { %v1481_v30 = vpop.f32.mrf.mxu1 }
 0x16a   :  { %v1478_v58 = vadd.f32 %v1477_v55, %v1294_v35  ;;  %886 = vmatmul.f32.gmra.mxu2 %v3081_v39  ;;  %1128 = vmatmul.f32.gmra.mxu3 %v3082_v26  ;;  %v3088_v55 = vand.u32 4294901760, %v3084_v6  ;;  %v3092_v26 = vld [vmem:[#allocation11_spill] sm:$0xff] }
 0x16c   :  { %1621 = vst [vmem:[%s2884_s2 + $0x28] sm:$0xff] %v1478_v58  ;;  %1544 = vmatmul.f32.gmra.mxu1 %v3080_v16  ;;  %v1301_v49 = vpop.f32.mrf.mxu0  ;;  %v3091_v16 = vand.u32 4294901760, %v3087_v18 }
 0x16d   :  { %v807_v42 = vpop.f32.mrf.mxu2  ;;  %v1033_v37 = vpop.f32.mrf.mxu3 }
 0x16e   :  { %v1034_v28 = vadd.f32 %v1033_v37, %v803_v0  ;;  %v808_v9 = vadd.f32 %v807_v42, %v609_v22  ;;  %v621_v0 = vadd.f32 %v2476_v29, %v2471_v62  ;;  %v3093_v42 = vld [vmem:[#allocation14_spill] sm:$0xff]  ;;  %v3094_v37 = vand.u32 4294901760, %v3090_v45 }
 0x16f   :  { %1364 = vmatmul.f32.gmra.mxu0 %v3083_v21 }
 0x170   :  { %v1298_v59 = vadd.f32 %v1297_v20, %v1034_v28  ;;  %v3089_v20 = vld [vmem:[#allocation9_spill] sm:$0xff] }
 0x171   :  { %v1485_v2 = vpop.f32.mrf.mxu1 }
 0x172   :  { %v1482_v7 = vadd.f32 %v1481_v30, %v1298_v59  ;;  %891 = vmatmul.f32.gmra.mxu2 %v3084_v6  ;;  %1134 = vmatmul.f32.gmra.mxu3 %v3085_v4  ;;  %v625_v6 = vadd.f32 %v2487_v46, %v2482_v33 }
 0x174   :  { %1622 = vst [vmem:[%s2884_s2 + $0x30] sm:$0xff] %v1482_v7  ;;  %1548 = vmatmul.f32.gmra.mxu1 %v3083_v21  ;;  %v1305_v41 = vpop.f32.mrf.mxu0  ;;  %v3095_v7 = vld [vmem:[#allocation13_spill] sm:$0xff] }
 0x175   :  { %v812_v5 = vpop.f32.mrf.mxu2  ;;  %v1039_v43 = vpop.f32.mrf.mxu3 }
 0x176   :  { %v1040_v52 = vadd.f32 %v1039_v43, %v808_v9  ;;  %v813_v54 = vadd.f32 %v812_v5, %v613_v14  ;;  %v3096_v9 = vld [vmem:[#allocation16_spill] sm:$0xff]  ;;  %v629_v14 = vadd.f32 %v2498_v57, %v2493_v53 }
 0x177   :  { %1368 = vmatmul.f32.gmra.mxu0 %v3086_v51 }
 0x178   :  { %v1302_v3 = vadd.f32 %v1301_v49, %v1040_v52 }
 0x179   :  { %v1489_v61 = vpop.f32.mrf.mxu1 }
 0x17a   :  { %v1486_v56 = vadd.f32 %v1485_v2, %v1302_v3  ;;  %896 = vmatmul.f32.gmra.mxu2 %v3087_v18  ;;  %1140 = vmatmul.f32.gmra.mxu3 %v3088_v55  ;;  %v3099_v18 = vld [vmem:[#allocation18_spill] sm:$0xff]  ;;  %v3100_v55 = vand.u32 4294901760, %v3096_v9 }
 0x17c   :  { %1623 = vst [vmem:[%s2884_s2 + $0x38] sm:$0xff] %v1486_v56  ;;  %1552 = vmatmul.f32.gmra.mxu1 %v3086_v51  ;;  %v1309_v27 = vpop.f32.mrf.mxu0 }
 0x17d   :  { %v817_v31 = vpop.f32.mrf.mxu2  ;;  %v1045_v13 = vpop.f32.mrf.mxu3 }
 0x17e   :  { %v1046_v36 = vadd.f32 %v1045_v13, %v813_v54  ;;  %v818_v35 = vadd.f32 %v817_v31, %v617_v40  ;;  %v3102_v40 = vld [vmem:[#allocation20_spill] sm:$0xff] }
 0x17f   :  { %1372 = vmatmul.f32.gmra.mxu0 %v3089_v20 }
 0x180   :  { %v1306_v19 = vadd.f32 %v1305_v41, %v1046_v36  ;;  %v3097_v41 = vand.u32 4294901760, %v3093_v42 }
 0x181   :  { %v1493_v50 = vpop.f32.mrf.mxu1 }
 0x182   :  { %v1490_v23 = vadd.f32 %v1489_v61, %v1306_v19  ;;  %901 = vmatmul.f32.gmra.mxu2 %v3090_v45  ;;  %1146 = vmatmul.f32.gmra.mxu3 %v3091_v16  ;;  %v3098_v61 = vld [vmem:[#allocation15_spill] sm:$0xff]  ;;  %v633_v19 = vadd.f32 %v2509_v8, %v2504_v32 }
 0x184   :  { %1624 = vst [vmem:[%s2884_s2 + $0x40] sm:$0xff] %v1490_v23  ;;  %1556 = vmatmul.f32.gmra.mxu1 %v3089_v20  ;;  %v1313_v30 = vpop.f32.mrf.mxu0  ;;  %v3101_v20 = vld [vmem:[#allocation17_spill] sm:$0xff]  ;;  %v3103_v23 = vand.u32 4294901760, %v3099_v18 }
 0x185   :  { %v822_v34 = vpop.f32.mrf.mxu2  ;;  %v1051_v58 = vpop.f32.mrf.mxu3 }
 0x186   :  { %v1052_v39 = vadd.f32 %v1051_v58, %v818_v35  ;;  %v823_v28 = vadd.f32 %v822_v34, %v621_v0  ;;  %v3104_v58 = vld [vmem:[#allocation19_spill] sm:$0xff] }
 0x187   :  { %1376 = vmatmul.f32.gmra.mxu0 %v3092_v26 }
 0x188   :  { %v1310_v17 = vadd.f32 %v1309_v27, %v1052_v39  ;;  %v637_v39 = vadd.f32 %v2520_v15, %v2515_v25 }
 0x189   :  { %v1497_v60 = vpop.f32.mrf.mxu1 }
 0x18a   :  { %v1494_v49 = vadd.f32 %v1493_v50, %v1310_v17  ;;  %906 = vmatmul.f32.gmra.mxu2 %v3093_v42  ;;  %1152 = vmatmul.f32.gmra.mxu3 %v3094_v37  ;;  %v3105_v17 = vld [vmem:[#allocation22_spill] sm:$0xff] }
 0x18c   :  { %1625 = vst [vmem:[%s2884_s2 + $0x48] sm:$0xff] %v1494_v49  ;;  %1560 = vmatmul.f32.gmra.mxu1 %v3092_v26  ;;  %v1317_v21 = vpop.f32.mrf.mxu0 }
 0x18d   :  { %v827_v59 = vpop.f32.mrf.mxu2  ;;  %v1057_v2 = vpop.f32.mrf.mxu3 }
 0x18e   :  { %v1058_v22 = vadd.f32 %v1057_v2, %v823_v28  ;;  %v828_v5 = vadd.f32 %v827_v59, %v625_v6  ;;  %v641_v59 = vadd.f32 %v2531_v63, %v2526_v11 }
 0x18f   :  { %1380 = vmatmul.f32.gmra.mxu0 %v3095_v7 }
 0x190   :  { %v1314_v62 = vadd.f32 %v1313_v30, %v1058_v22  ;;  %v3108_v22 = vld [vmem:[#allocation24_spill] sm:$0xff] }
 0x191   :  { %v1501_v29 = vpop.f32.mrf.mxu1 }
 0x192   :  { %v1498_v4 = vadd.f32 %v1497_v60, %v1314_v62  ;;  %911 = vmatmul.f32.gmra.mxu2 %v3096_v9  ;;  %1158 = vmatmul.f32.gmra.mxu3 %v3097_v41  ;;  %v3106_v60 = vand.u32 4294901760, %v3102_v40  ;;  %v3110_v41 = vld [vmem:[#allocation23_spill] sm:$0xff] }
 0x194   :  { %1626 = vst [vmem:[%s2884_s2 + $0x50] sm:$0xff] %v1498_v4  ;;  %1564 = vmatmul.f32.gmra.mxu1 %v3095_v7  ;;  %v1321_v43 = vpop.f32.mrf.mxu0  ;;  %v3109_v7 = vand.u32 4294901760, %v3105_v17 }
 0x195   :  { %v832_v52 = vpop.f32.mrf.mxu2  ;;  %v1063_v51 = vpop.f32.mrf.mxu3 }
 0x196   :  { %v1064_v3 = vadd.f32 %v1063_v51, %v828_v5  ;;  %v833_v54 = vadd.f32 %v832_v52, %v629_v14  ;;  %v645_v5 = vadd.f32 %v2542_v24, %v2537_v47  ;;  %v3111_v52 = vld [vmem:[#allocation26_spill] sm:$0xff]  ;;  %v3112_v51 = vand.u32 4294901760, %v3108_v22 }
 0x197   :  { %1384 = vmatmul.f32.gmra.mxu0 %v3098_v61 }
 0x198   :  { %v1318_v33 = vadd.f32 %v1317_v21, %v1064_v3  ;;  %v3107_v21 = vld [vmem:[#allocation21_spill] sm:$0xff] }
 0x199   :  { %v1505_v46 = vpop.f32.mrf.mxu1 }
 0x19a   :  { %v1502_v56 = vadd.f32 %v1501_v29, %v1318_v33  ;;  %916 = vmatmul.f32.gmra.mxu2 %v3099_v18  ;;  %1164 = vmatmul.f32.gmra.mxu3 %v3100_v55  ;;  %v649_v18 = vadd.f32 %v2553_v48, %v2548_v12 }
 0x19c   :  { %1627 = vst [vmem:[%s2884_s2 + $0x58] sm:$0xff] %v1502_v56  ;;  %1568 = vmatmul.f32.gmra.mxu1 %v3098_v61  ;;  %v1325_v27 = vpop.f32.mrf.mxu0  ;;  %v3113_v56 = vld [vmem:[#allocation25_spill] sm:$0xff] }
 0x19d   :  { %v837_v31 = vpop.f32.mrf.mxu2  ;;  %v1069_v13 = vpop.f32.mrf.mxu3 }
 0x19e   :  { %v1070_v36 = vadd.f32 %v1069_v13, %v833_v54  ;;  %v838_v45 = vadd.f32 %v837_v31, %v633_v19  ;;  %v3114_v54 = vld [vmem:[#allocation28_spill] sm:$0xff]  ;;  %v653_v19 = vadd.f32 %v2564_v1, %v2559_v38 }
 0x19f   :  { %1388 = vmatmul.f32.gmra.mxu0 %v3101_v20 }
 0x1a0   :  { %v1322_v53 = vadd.f32 %v1321_v43, %v1070_v36 }
 0x1a1   :  { %v1509_v57 = vpop.f32.mrf.mxu1 }
 0x1a2   :  { %v1506_v50 = vadd.f32 %v1505_v46, %v1322_v53  ;;  %921 = vmatmul.f32.gmra.mxu2 %v3102_v40  ;;  %1170 = vmatmul.f32.gmra.mxu3 %v3103_v23  ;;  %v3117_v40 = vld [vmem:[#allocation30_spill] sm:$0xff]  ;;  %v3118_v23 = vand.u32 4294901760, %v3114_v54 }
 0x1a4   :  { %1628 = vst [vmem:[%s2884_s2 + $0x60] sm:$0xff] %v1506_v50  ;;  %1572 = vmatmul.f32.gmra.mxu1 %v3101_v20  ;;  %v1329_v16 = vpop.f32.mrf.mxu0 }
 0x1a5   :  { %v842_v35 = vpop.f32.mrf.mxu2  ;;  %v1075_v30 = vpop.f32.mrf.mxu3 }
 0x1a6   :  { %v1076_v34 = vadd.f32 %v1075_v30, %v838_v45  ;;  %v843_v0 = vadd.f32 %v842_v35, %v637_v39  ;;  %v3120_v39 = vld [vmem:[#allocation32_spill] sm:$0xff] }
 0x1a7   :  { %1392 = vmatmul.f32.gmra.mxu0 %v3104_v58 }
 0x1a8   :  { %v1326_v32 = vadd.f32 %v1325_v27, %v1076_v34  ;;  %v3115_v27 = vand.u32 4294901760, %v3111_v52 }
 0x1a9   :  { %v1513_v8 = vpop.f32.mrf.mxu1 }
 0x1aa   :  { %v1510_v26 = vadd.f32 %v1509_v57, %v1326_v32  ;;  %926 = vmatmul.f32.gmra.mxu2 %v3105_v17  ;;  %1176 = vmatmul.f32.gmra.mxu3 %v3106_v60  ;;  %v3116_v57 = vld [vmem:[#allocation27_spill] sm:$0xff]  ;;  %v657_v32 = vadd.f32 %v2575_v10, %v2570_v44 }
 0x1ac   :  { %1629 = vst [vmem:[%s2884_s2 + $0x68] sm:$0xff] %v1510_v26  ;;  %1576 = vmatmul.f32.gmra.mxu1 %v3104_v58  ;;  %v1333_v49 = vpop.f32.mrf.mxu0  ;;  %v3119_v58 = vld [vmem:[#allocation29_spill] sm:$0xff]  ;;  %v3121_v26 = vand.u32 4294901760, %v3117_v40 }
 0x1ad   :  { %v847_v42 = vpop.f32.mrf.mxu2  ;;  %v1081_v37 = vpop.f32.mrf.mxu3 }
 0x1ae   :  { %v1082_v28 = vadd.f32 %v1081_v37, %v843_v0  ;;  %v848_v62 = vadd.f32 %v847_v42, %v641_v59  ;;  %v3122_v37 = vld [vmem:[#allocation31_spill] sm:$0xff] }
 0x1af   :  { %1396 = vmatmul.f32.gmra.mxu0 %v3107_v21 }
 0x1b0   :  { %v1330_v25 = vadd.f32 %v1329_v16, %v1082_v28 }
 0x1b1   :  { %v1517_v15 = vpop.f32.mrf.mxu1 }
 0x1b2   :  { %v1514_v2 = vadd.f32 %v1513_v8, %v1330_v25  ;;  %931 = vmatmul.f32.gmra.mxu2 %v3108_v22  ;;  %1182 = vmatmul.f32.gmra.mxu3 %v3109_v7  ;;  %v3124_v25 = vand.u32 4294901760, %v3120_v39 }
 0x1b4   :  { %1630 = vst [vmem:[%s2884_s2 + $0x70] sm:$0xff] %v1514_v2  ;;  %1580 = vmatmul.f32.gmra.mxu1 %v3107_v21  ;;  %v1337_v29 = vpop.f32.mrf.mxu0  ;;  %v3123_v21 = vld [vmem:[#allocation34_spill] sm:$0xff] }
 0x1b5   :  { %v852_v6 = vpop.f32.mrf.mxu2  ;;  %v1087_v4 = vpop.f32.mrf.mxu3 }
 0x1b6   :  { %v1088_v9 = vadd.f32 %v1087_v4, %v848_v62  ;;  %v853_v3 = vadd.f32 %v852_v6, %v645_v5 }
 0x1b7   :  { %1400 = vmatmul.f32.gmra.mxu0 %v3110_v41 }
 0x1b8   :  { %v1334_v11 = vadd.f32 %v1333_v49, %v1088_v9 }
 0x1b9   :  { %v1521_v63 = vpop.f32.mrf.mxu1 }
 0x1ba   :  { %v1518_v43 = vadd.f32 %v1517_v15, %v1334_v11  ;;  %936 = vmatmul.f32.gmra.mxu2 %v3111_v52  ;;  %1188 = vmatmul.f32.gmra.mxu3 %v3112_v51  ;;  %v3125_v15 = vld [vmem:[#allocation39_spill] sm:$0xff]  ;;  %v3128_v11 = vand.u32 4294901760, %v3123_v21 }
 0x1bc   :  { %1631 = vst [vmem:[%s2884_s2 + $0x78] sm:$0xff] %v1518_v43  ;;  %1584 = vmatmul.f32.gmra.mxu1 %v3110_v41  ;;  %v1341_v61 = vpop.f32.mrf.mxu0  ;;  %v3127_v41 = vld [vmem:[#allocation36_spill] sm:$0xff] }
 0x1bd   :  { %v857_v33 = vpop.f32.mrf.mxu2  ;;  %v1093_v46 = vpop.f32.mrf.mxu3 }
 0x1be   :  { %v1094_v14 = vadd.f32 %v1093_v46, %v853_v3  ;;  %v858_v31 = vadd.f32 %v857_v33, %v649_v18 }
 0x1bf   :  { %1404 = vmatmul.f32.gmra.mxu0 %v3113_v56 }
 0x1c0   :  { %v1338_v47 = vadd.f32 %v1337_v29, %v1094_v14  ;;  %v3126_v29 = vld [vmem:[#allocation33_spill] sm:$0xff] }
 0x1c1   :  { %v1525_v24 = vpop.f32.mrf.mxu1 }
 0x1c2   :  { %v1522_v55 = vadd.f32 %v1521_v63, %v1338_v47  ;;  %941 = vmatmul.f32.gmra.mxu2 %v3114_v54  ;;  %1194 = vmatmul.f32.gmra.mxu3 %v3115_v27  ;;  %v3129_v63 = vld [vmem:[#allocation40_spill] sm:$0xff]  ;;  %v3132_v47 = vand.u32 4294901760, %v3127_v41 }
 0x1c4   :  { %1632 = vst [vmem:[%s2884_s2 + $0x80] sm:$0xff] %v1522_v55  ;;  %1588 = vmatmul.f32.gmra.mxu1 %v3113_v56  ;;  %v1345_v13 = vpop.f32.mrf.mxu0  ;;  %v3131_v56 = vld [vmem:[#allocation38_spill] sm:$0xff] }
 0x1c5   :  { %v862_v36 = vpop.f32.mrf.mxu2  ;;  %v1099_v20 = vpop.f32.mrf.mxu3 }
 0x1c6   :  { %v1100_v53 = vadd.f32 %v1099_v20, %v858_v31  ;;  %v863_v45 = vadd.f32 %v862_v36, %v653_v19 }
 0x1c7   :  { %1408 = vmatmul.f32.gmra.mxu0 %v3116_v57 }
 0x1c8   :  { %v1342_v12 = vadd.f32 %v1341_v61, %v1100_v53  ;;  %v3130_v61 = vld [vmem:[#allocation35_spill] sm:$0xff] }
 0x1c9   :  { %v1529_v48 = vpop.f32.mrf.mxu1 }
 0x1ca   :  { %v1526_v50 = vadd.f32 %v1525_v24, %v1342_v12  ;;  %946 = vmatmul.f32.gmra.mxu2 %v3117_v40  ;;  %1200 = vmatmul.f32.gmra.mxu3 %v3118_v23  ;;  %v3133_v24 = vld [vmem:[#allocation41_spill] sm:$0xff]  ;;  %v3136_v12 = vld [vmem:[#allocation42_spill] sm:$0xff] }
 0x1cc   :  { %1633 = vst [vmem:[%s2884_s2 + $0x88] sm:$0xff] %v1526_v50  ;;  %1592 = vmatmul.f32.gmra.mxu1 %v3116_v57  ;;  %v1349_v16 = vpop.f32.mrf.mxu0  ;;  %v3135_v57 = vand.u32 4294901760, %v3131_v56 }
 0x1cd   :  { %v867_v35 = vpop.f32.mrf.mxu2  ;;  %v1105_v30 = vpop.f32.mrf.mxu3 }
 0x1ce   :  { %v1106_v34 = vadd.f32 %v1105_v30, %v863_v45  ;;  %v868_v17 = vadd.f32 %v867_v35, %v657_v32  ;;  %v3137_v30 = vld [vmem:[#allocation43_spill] sm:$0xff] }
 0x1cf   :  { %1412 = vmatmul.f32.gmra.mxu0 %v3119_v58 }
 0x1d0   :  { %v1346_v38 = vadd.f32 %v1345_v13, %v1106_v34  ;;  %v3134_v13 = vld [vmem:[#allocation37_spill] sm:$0xff] }
 0x1d1   :  { %v1533_v1 = vpop.f32.mrf.mxu1 }
 0x1d2   :  { %v1530_v8 = vadd.f32 %v1529_v48, %v1346_v38  ;;  %951 = vmatmul.f32.gmra.mxu2 %v3120_v39  ;;  %1206 = vmatmul.f32.gmra.mxu3 %v3121_v26 }
 0x1d4   :  { %1634 = vst [vmem:[%s2884_s2 + $0x90] sm:$0xff] %v1530_v8  ;;  %1596 = vmatmul.f32.gmra.mxu1 %v3119_v58  ;;  %v1353_v60 = vpop.f32.mrf.mxu0 }
 0x1d5   :  { %v872_v0 = vpop.f32.mrf.mxu2  ;;  %v1111_v49 = vpop.f32.mrf.mxu3 }
 0x1d6   :  { %v1112_v42 = vadd.f32 %v1111_v49, %v868_v17  ;;  %v873_v59 = vadd.f32 %v872_v0, %v3125_v15  ;;  %v3138_v17 = vld [vmem:[#allocation44_spill] sm:$0xff] }
 0x1d7   :  { %1416 = vmatmul.f32.gmra.mxu0 %v3122_v37 }
 0x1d8   :  { %v1350_v44 = vadd.f32 %v1349_v16, %v1112_v42 }
 0x1d9   :  { %v1537_v10 = vpop.f32.mrf.mxu1 }
 0x1da   :  { %v1534_v28 = vadd.f32 %v1533_v1, %v1350_v44  ;;  %956 = vmatmul.f32.gmra.mxu2 %v3123_v21  ;;  %1212 = vmatmul.f32.gmra.mxu3 %v3124_v25  ;;  %v3139_v21 = vld [vmem:[#allocation45_spill] sm:$0xff] }
 0x1dc   :  { %1635 = vst [vmem:[%s2884_s2 + $0x98] sm:$0xff] %v1534_v28  ;;  %1600 = vmatmul.f32.gmra.mxu1 %v3122_v37  ;;  %v1357_v2 = vpop.f32.mrf.mxu0 }
 0x1dd   :  { %v877_v22 = vpop.f32.mrf.mxu2  ;;  %v1117_v7 = vpop.f32.mrf.mxu3 }
 0x1de   :  { %v1118_v62 = vadd.f32 %v1117_v7, %v873_v59  ;;  %v878_v5 = vadd.f32 %v877_v22, %v3129_v63 }
 0x1df   :  { %1420 = vmatmul.f32.gmra.mxu0 %v3126_v29 }
 0x1e0   :  { %v1354_v6 = vadd.f32 %v1353_v60, %v1118_v62 }
 0x1e1   :  { %v1541_v4 = vpop.f32.mrf.mxu1 }
 0x1e2   :  { %v1538_v9 = vadd.f32 %v1537_v10, %v1354_v6  ;;  %961 = vmatmul.f32.gmra.mxu2 %v3127_v41  ;;  %1218 = vmatmul.f32.gmra.mxu3 %v3128_v11  ;;  %v3140_v6 = vld [vmem:[#allocation46_spill] sm:$0xff] }
 0x1e4   :  { %1636 = vst [vmem:[%s2884_s2 + $0xa0] sm:$0xff] %v1538_v9  ;;  %1604 = vmatmul.f32.gmra.mxu1 %v3126_v29  ;;  %v1361_v43 = vpop.f32.mrf.mxu0 }
 0x1e5   :  { %v882_v52 = vpop.f32.mrf.mxu2  ;;  %v1123_v51 = vpop.f32.mrf.mxu3 }
 0x1e6   :  { %v1124_v3 = vadd.f32 %v1123_v51, %v878_v5  ;;  %v883_v18 = vadd.f32 %v882_v52, %v3133_v24  ;;  %v3141_v51 = vld [vmem:[#allocation47_spill] sm:$0xff] }
 0x1e7   :  { %1424 = vmatmul.f32.gmra.mxu0 %v3130_v61 }
 0x1e8   :  { %v1358_v33 = vadd.f32 %v1357_v2, %v1124_v3 }
 0x1e9   :  { %v1545_v46 = vpop.f32.mrf.mxu1 }
 0x1ea   :  { %v1542_v14 = vadd.f32 %v1541_v4, %v1358_v33  ;;  %966 = vmatmul.f32.gmra.mxu2 %v3131_v56  ;;  %1224 = vmatmul.f32.gmra.mxu3 %v3132_v47 }
 0x1ec   :  { %1637 = vst [vmem:[%s2884_s2 + $0xa8] sm:$0xff] %v1542_v14  ;;  %1608 = vmatmul.f32.gmra.mxu1 %v3130_v61  ;;  %v1365_v55 = vpop.f32.mrf.mxu0 }
 0x1ed   :  { %v887_v54 = vpop.f32.mrf.mxu2  ;;  %v1129_v27 = vpop.f32.mrf.mxu3 }
 0x1ee   :  { %v1130_v31 = vadd.f32 %v1129_v27, %v883_v18  ;;  %v888_v48 = vadd.f32 %v887_v54, %v3136_v12  ;;  %v3142_v18 = vld [vmem:[#allocation48_spill] sm:$0xff] }
 0x1ef   :  { %1428 = vmatmul.f32.gmra.mxu0 %v3134_v13 }
 0x1f0   :  { %v1362_v36 = vadd.f32 %v1361_v43, %v1130_v31 }
 0x1f1   :  { %v1549_v20 = vpop.f32.mrf.mxu1 }
 0x1f2   :  { %v1546_v53 = vadd.f32 %v1545_v46, %v1362_v36  ;;  %1230 = vmatmul.f32.gmra.mxu3 %v3135_v57  ;;  %v3143_v57 = vld [vmem:[#allocation49_spill] sm:$0xff] }
 0x1f4   :  { %1638 = vst [vmem:[%s2884_s2 + $0xb0] sm:$0xff] %v1546_v53  ;;  %1612 = vmatmul.f32.gmra.mxu1 %v3134_v13  ;;  %v1369_v19 = vpop.f32.mrf.mxu0 }
 0x1f5   :  { %v892_v50 = vpop.f32.mrf.mxu2  ;;  %v1135_v40 = vpop.f32.mrf.mxu3 }
 0x1f6   :  { %v1136_v23 = vadd.f32 %v1135_v40, %v888_v48  ;;  %v893_v34 = vadd.f32 %v892_v50, %v3137_v30 }
 0x1f8   :  { %v1366_v45 = vadd.f32 %v1365_v55, %v1136_v23 }
 0x1f9   :  { %v1553_v16 = vpop.f32.mrf.mxu1 }
 0x1fa   :  { %v1550_v35 = vadd.f32 %v1549_v20, %v1366_v45 }
 0x1fc   :  { %1639 = vst [vmem:[%s2884_s2 + $0xb8] sm:$0xff] %v1550_v35  ;;  %v1373_v58 = vpop.f32.mrf.mxu0  ;;  %v3144_v35 = vld [vmem:[#allocation50_spill] sm:$0xff] }
 0x1fd   :  { %v897_v38 = vpop.f32.mrf.mxu2  ;;  %v1141_v1 = vpop.f32.mrf.mxu3 }
 0x1fe   :  { %v1142_v32 = vadd.f32 %v1141_v1, %v893_v34  ;;  %v898_v60 = vadd.f32 %v897_v38, %v3138_v17 }
 0x200   :  { %v1370_v8 = vadd.f32 %v1369_v19, %v1142_v32 }
 0x201   :  { %v1557_v39 = vpop.f32.mrf.mxu1 }
 0x202   :  { %v1554_v26 = vadd.f32 %v1553_v16, %v1370_v8 }
 0x204   :  { %1640 = vst [vmem:[%s2884_s2 + $0xc0] sm:$0xff] %v1554_v26  ;;  %v1377_v0 = vpop.f32.mrf.mxu0  ;;  %v3145_v26 = vld [vmem:[#allocation51_spill] sm:$0xff] }
 0x205   :  { %v902_v49 = vpop.f32.mrf.mxu2  ;;  %v1147_v42 = vpop.f32.mrf.mxu3 }
 0x206   :  { %v1148_v37 = vadd.f32 %v1147_v42, %v898_v60  ;;  %v903_v25 = vadd.f32 %v902_v49, %v3139_v21 }
 0x208   :  { %v1374_v44 = vadd.f32 %v1373_v58, %v1148_v37 }
 0x209   :  { %v1561_v10 = vpop.f32.mrf.mxu1 }
 0x20a   :  { %v1558_v28 = vadd.f32 %v1557_v39, %v1374_v44 }
 0x20c   :  { %1641 = vst [vmem:[%s2884_s2 + $0xc8] sm:$0xff] %v1558_v28  ;;  %v1381_v15 = vpop.f32.mrf.mxu0  ;;  %v3146_v28 = vld [vmem:[#allocation52_spill] sm:$0xff] }
 0x20d   :  { %v907_v59 = vpop.f32.mrf.mxu2  ;;  %v1153_v2 = vpop.f32.mrf.mxu3 }
 0x20e   :  { %v1154_v22 = vadd.f32 %v1153_v2, %v903_v25  ;;  %v908_v4 = vadd.f32 %v907_v59, %v3140_v6 }
 0x210   :  { %v1378_v7 = vadd.f32 %v1377_v0, %v1154_v22 }
 0x211   :  { %v1565_v62 = vpop.f32.mrf.mxu1 }
 0x212   :  { %v1562_v29 = vadd.f32 %v1561_v10, %v1378_v7 }
 0x214   :  { %1642 = vst [vmem:[%s2884_s2 + $0xd0] sm:$0xff] %v1562_v29  ;;  %v1385_v9 = vpop.f32.mrf.mxu0  ;;  %v3147_v29 = vld [vmem:[#allocation53_spill] sm:$0xff] }
 0x215   :  { %v912_v41 = vpop.f32.mrf.mxu2  ;;  %v1159_v11 = vpop.f32.mrf.mxu3 }
 0x216   :  { %v1160_v63 = vadd.f32 %v1159_v11, %v908_v4  ;;  %v913_v3 = vadd.f32 %v912_v41, %v3141_v51 }
 0x218   :  { %v1382_v5 = vadd.f32 %v1381_v15, %v1160_v63 }
 0x219   :  { %v1569_v43 = vpop.f32.mrf.mxu1 }
 0x21a   :  { %v1566_v52 = vadd.f32 %v1565_v62, %v1382_v5 }
 0x21c   :  { %1643 = vst [vmem:[%s2884_s2 + $0xd8] sm:$0xff] %v1566_v52  ;;  %v1389_v61 = vpop.f32.mrf.mxu0  ;;  %v3148_v52 = vld [vmem:[#allocation54_spill] sm:$0xff] }
 0x21d   :  { %v917_v33 = vpop.f32.mrf.mxu2  ;;  %v1165_v46 = vpop.f32.mrf.mxu3 }
 0x21e   :  { %v1166_v14 = vadd.f32 %v1165_v46, %v913_v3  ;;  %v918_v55 = vadd.f32 %v917_v33, %v3142_v18 }
 0x220   :  { %v1386_v56 = vadd.f32 %v1385_v9, %v1166_v14 }
 0x221   :  { %v1573_v47 = vpop.f32.mrf.mxu1 }
 0x222   :  { %v1570_v24 = vadd.f32 %v1569_v43, %v1386_v56 }
 0x224   :  { %1644 = vst [vmem:[%s2884_s2 + $0xe0] sm:$0xff] %v1570_v24  ;;  %v1393_v54 = vpop.f32.mrf.mxu0  ;;  %v3149_v24 = vld [vmem:[#allocation55_spill] sm:$0xff] }
 0x225   :  { %v922_v27 = vpop.f32.mrf.mxu2  ;;  %v1171_v31 = vpop.f32.mrf.mxu3 }
 0x226   :  { %v1172_v13 = vadd.f32 %v1171_v31, %v918_v55  ;;  %v923_v12 = vadd.f32 %v922_v27, %v3143_v57 }
 0x228   :  { %v1390_v36 = vadd.f32 %v1389_v61, %v1172_v13 }
 0x229   :  { %v1577_v20 = vpop.f32.mrf.mxu1 }
 0x22a   :  { %v1574_v53 = vadd.f32 %v1573_v47, %v1390_v36 }
 0x22c   :  { %1645 = vst [vmem:[%s2884_s2 + $0xe8] sm:$0xff] %v1574_v53  ;;  %v1397_v48 = vpop.f32.mrf.mxu0  ;;  %v3150_v53 = vld [vmem:[#allocation56_spill] sm:$0xff] }
 0x22d   :  { %v927_v19 = vpop.f32.mrf.mxu2  ;;  %v1177_v50 = vpop.f32.mrf.mxu3 }
 0x22e   :  { %v1178_v40 = vadd.f32 %v1177_v50, %v923_v12  ;;  %v928_v30 = vadd.f32 %v927_v19, %v3144_v35 }
 0x230   :  { %v1394_v23 = vadd.f32 %v1393_v54, %v1178_v40 }
 0x231   :  { %v1581_v45 = vpop.f32.mrf.mxu1 }
 0x232   :  { %v1578_v16 = vadd.f32 %v1577_v20, %v1394_v23 }
 0x234   :  { %1646 = vst [vmem:[%s2884_s2 + $0xf0] sm:$0xff] %v1578_v16  ;;  %v1401_v34 = vpop.f32.mrf.mxu0 }
 0x235   :  { %v932_v58 = vpop.f32.mrf.mxu2  ;;  %v1183_v38 = vpop.f32.mrf.mxu3 }
 0x236   :  { %v1184_v1 = vadd.f32 %v1183_v38, %v928_v30  ;;  %v933_v17 = vadd.f32 %v932_v58, %v3145_v26 }
 0x238   :  { %v1398_v32 = vadd.f32 %v1397_v48, %v1184_v1 }
 0x239   :  { %v1585_v8 = vpop.f32.mrf.mxu1 }
 0x23a   :  { %v1582_v39 = vadd.f32 %v1581_v45, %v1398_v32  ;;  %v3151_v45 = vld [vmem:[#allocation57_spill] sm:$0xff]  ;;  %v3152_v32 = vld [vmem:[#allocation58_spill] sm:$0xff] }
 0x23c   :  { %1647 = vst [vmem:[%s2884_s2 + $0xf8] sm:$0xff] %v1582_v39  ;;  %v1405_v60 = vpop.f32.mrf.mxu0 }
 0x23d   :  { %v937_v0 = vpop.f32.mrf.mxu2  ;;  %v1189_v49 = vpop.f32.mrf.mxu3 }
 0x23e   :  { %v1190_v42 = vadd.f32 %v1189_v49, %v933_v17  ;;  %v938_v21 = vadd.f32 %v937_v0, %v3146_v28 }
 0x240   :  { %v1402_v37 = vadd.f32 %v1401_v34, %v1190_v42 }
 0x241   :  { %v1589_v44 = vpop.f32.mrf.mxu1 }
 0x242   :  { %v1586_v10 = vadd.f32 %v1585_v8, %v1402_v37 }
 0x244   :  { %1648 = vst [vmem:[%s2884_s2 + $0x100] sm:$0xff] %v1586_v10  ;;  %v1409_v25 = vpop.f32.mrf.mxu0 }
 0x245   :  { %v942_v15 = vpop.f32.mrf.mxu2  ;;  %v1195_v59 = vpop.f32.mrf.mxu3 }
 0x246   :  { %v1196_v2 = vadd.f32 %v1195_v59, %v938_v21  ;;  %v943_v6 = vadd.f32 %v942_v15, %v3147_v29 }
 0x248   :  { %v1406_v22 = vadd.f32 %v1405_v60, %v1196_v2 }
 0x249   :  { %v1593_v7 = vpop.f32.mrf.mxu1 }
 0x24a   :  { %v1590_v62 = vadd.f32 %v1589_v44, %v1406_v22 }
 0x24c   :  { %1649 = vst [vmem:[%s2884_s2 + $0x108] sm:$0xff] %v1590_v62  ;;  %v1413_v4 = vpop.f32.mrf.mxu0 }
 0x24d   :  { %v947_v9 = vpop.f32.mrf.mxu2  ;;  %v1201_v41 = vpop.f32.mrf.mxu3 }
 0x24e   :  { %v1202_v11 = vadd.f32 %v1201_v41, %v943_v6  ;;  %v948_v51 = vadd.f32 %v947_v9, %v3148_v52 }
 0x250   :  { %v1410_v63 = vadd.f32 %v1409_v25, %v1202_v11 }
 0x251   :  { %v1597_v5 = vpop.f32.mrf.mxu1 }
 0x252   :  { %v1594_v43 = vadd.f32 %v1593_v7, %v1410_v63 }
 0x254   :  { %1650 = vst [vmem:[%s2884_s2 + $0x110] sm:$0xff] %v1594_v43  ;;  %v1417_v46 = vpop.f32.mrf.mxu0 }
 0x255   :  { %v952_v3 = vpop.f32.mrf.mxu2  ;;  %v1207_v61 = vpop.f32.mrf.mxu3 }
 0x256   :  { %v1208_v33 = vadd.f32 %v1207_v61, %v948_v51  ;;  %v953_v18 = vadd.f32 %v952_v3, %v3149_v24 }
 0x258   :  { %v1414_v14 = vadd.f32 %v1413_v4, %v1208_v33 }
 0x259   :  { %v1601_v56 = vpop.f32.mrf.mxu1 }
 0x25a   :  { %v1598_v47 = vadd.f32 %v1597_v5, %v1414_v14 }
 0x25c   :  { %1651 = vst [vmem:[%s2884_s2 + $0x118] sm:$0xff] %v1598_v47  ;;  %v1421_v13 = vpop.f32.mrf.mxu0 }
 0x25d   :  { %v957_v55 = vpop.f32.mrf.mxu2  ;;  %v1213_v54 = vpop.f32.mrf.mxu3 }
 0x25e   :  { %v1214_v27 = vadd.f32 %v1213_v54, %v953_v18  ;;  %v958_v57 = vadd.f32 %v957_v55, %v3150_v53 }
 0x260   :  { %v1418_v31 = vadd.f32 %v1417_v46, %v1214_v27 }
 0x261   :  { %v1605_v20 = vpop.f32.mrf.mxu1 }
 0x262   :  { %v1602_v36 = vadd.f32 %v1601_v56, %v1418_v31 }
 0x264   :  { %1652 = vst [vmem:[%s2884_s2 + $0x120] sm:$0xff] %v1602_v36  ;;  %v1425_v23 = vpop.f32.mrf.mxu0 }
 0x265   :  { %v1219_v12 = vpop.f32.mrf.mxu3  ;;  %v962_v19 = vpop.f32.mrf.mxu2 }
 0x266   :  { %v1220_v48 = vadd.f32 %v1219_v12, %v958_v57  ;;  %v963_v16 = vadd.f32 %v962_v19, %v3151_v45 }
 0x268   :  { %v1422_v50 = vadd.f32 %v1421_v13, %v1220_v48 }
 0x269   :  { %v1609_v30 = vpop.f32.mrf.mxu1 }
 0x26a   :  { %v1606_v40 = vadd.f32 %v1605_v20, %v1422_v50 }
 0x26c   :  { %1653 = vst [vmem:[%s2884_s2 + $0x128] sm:$0xff] %v1606_v40  ;;  %v1429_v26 = vpop.f32.mrf.mxu0 }
 0x26d   :  { %v1225_v35 = vpop.f32.mrf.mxu3  ;;  %v967_v38 = vpop.f32.mrf.mxu2 }
 0x26e   :  { %v1226_v34 = vadd.f32 %v1225_v35, %v963_v16  ;;  %v968_v8 = vadd.f32 %v967_v38, %v3152_v32 }
 0x270   :  { %v1426_v58 = vadd.f32 %v1425_v23, %v1226_v34 }
 0x271   :  { %v1613_v60 = vpop.f32.mrf.mxu1 }
 0x272   :  { %v1610_v1 = vadd.f32 %v1609_v30, %v1426_v58 }
 0x274   :  { %1654 = vst [vmem:[%s2884_s2 + $0x130] sm:$0xff] %v1610_v1 }
 0x275   :  { %v1231_v39 = vpop.f32.mrf.mxu3 }
 0x276   :  { %v1232_v17 = vadd.f32 %v1231_v39, %v968_v8 }
 0x278   :  { %v1430_v0 = vadd.f32 %v1429_v26, %v1232_v17 }
 0x27a   :  { %v1614_v49 = vadd.f32 %v1613_v60, %v1430_v0 }
 0x27c   :  { %1655 = vst [vmem:[%s2884_s2 + $0x138] sm:$0xff] %v1614_v49 }

</bundles_post_ra>
